<compile_context>
chip_gen: v6e
topology: v6e:2x2x1
jax: 0.10.0
libtpu: 0.0.40
codegen_flags: <defaults>
</compile_context>

<pallas_src>
import functools

import numpy as np
import jax
import jax.numpy as jnp
from jax import lax
from jax.experimental import pallas as pl
from jax.experimental.pallas import tpu as pltpu


# ---------------------------------------------------------------------------
# Pallas kernels
# ---------------------------------------------------------------------------
def _conv_s2d_lrelu_kernel(r0_ref, r1_ref, w_ref, b_ref, o_ref, *, wo, alpha):
    """One output row of a 4x4/s2/p1 conv on space-to-depth(padded) input.
    Four shifted-window (wo, 4*Cin) @ (4*Cin, Cout) MXU dots, fp32 accumulate,
    fused bias + LeakyReLU epilogue."""
    acc = jnp.dot(r0_ref[pl.ds(0, wo), :], w_ref[0],
                  preferred_element_type=jnp.float32)
    acc += jnp.dot(r0_ref[pl.ds(1, wo), :], w_ref[1],
                   preferred_element_type=jnp.float32)
    acc += jnp.dot(r1_ref[pl.ds(0, wo), :], w_ref[2],
                   preferred_element_type=jnp.float32)
    acc += jnp.dot(r1_ref[pl.ds(1, wo), :], w_ref[3],
                   preferred_element_type=jnp.float32)
    y = acc + b_ref[...]
    y = jnp.where(y >= 0.0, y, alpha * y)
    o_ref[...] = y.astype(o_ref.dtype)


def _conv_s2d_stats_kernel(r0_ref, r1_ref, w_ref, b_ref, o_ref, sum_ref,
                           ssq_ref, *, wo):
    """Same conv (no activation) plus fused per-row per-channel sum and
    sum-of-squares (BatchNorm batch statistics) on the fp32 result."""
    acc = jnp.dot(r0_ref[pl.ds(0, wo), :], w_ref[0],
                  preferred_element_type=jnp.float32)
    acc += jnp.dot(r0_ref[pl.ds(1, wo), :], w_ref[1],
                   preferred_element_type=jnp.float32)
    acc += jnp.dot(r1_ref[pl.ds(0, wo), :], w_ref[2],
                   preferred_element_type=jnp.float32)
    acc += jnp.dot(r1_ref[pl.ds(1, wo), :], w_ref[3],
                   preferred_element_type=jnp.float32)
    y = acc + b_ref[...]
    o_ref[...] = y.astype(o_ref.dtype)
    sum_ref[...] = jnp.sum(y, axis=0, keepdims=True)
    ssq_ref[...] = jnp.sum(y * y, axis=0, keepdims=True)


def _head_kernel(y_ref, scale_ref, shift_ref, keff_ref, b_ref, o_ref, *, alpha):
    """Fused BN-normalize + LeakyReLU + conv3(4x4/s2/p1, Cout=1) +
    AdaptiveAvgPool2d(1) + Sigmoid on the flattened (N, H*W*C) features."""
    z = y_ref[...].astype(jnp.float32) * scale_ref[...] + shift_ref[...]
    z = jnp.where(z >= 0.0, z, alpha * z)
    v = jnp.sum(z * keff_ref[...], axis=1, keepdims=True)        # (N, 1)
    o_ref[...] = 1.0 / (1.0 + jnp.exp(-(v + b_ref[...])))


# ---------------------------------------------------------------------------
# Kernel wrappers
# ---------------------------------------------------------------------------
def conv_weight_taps(w):
    """PyTorch OIHW 4x4 conv weight -> (4, 4*Cin, Cout) tap-stacked GEMM weight
    matching the s2d channel order (row-parity a, col-parity b, channel c);
    tap index = 2*sy + sx with (sy, sx) the 2x2/s1 window offset."""
    cout, cin, _, _ = w.shape
    w6 = w.reshape(cout, cin, 2, 2, 2, 2)           # (co, c, sy, a, sx, b)
    w6 = jnp.transpose(w6, (2, 4, 3, 5, 1, 0))      # (sy, sx, a, b, c, co)
    return w6.reshape(4, 4 * cin, cout)


def conv4x4_s2(x_nhwc, w_taps, bias, *, alpha=0.2, stats=False,
               out_dtype=jnp.bfloat16):
    """4x4 / stride-2 / pad-1 conv on NHWC input via the space-to-depth trick.
    Returns (N, H/2, W/2, Cout); when stats=True also per-row BN partial sums
    and sums-of-squares of shape (N, H/2, 1, Cout)."""
    N, H, W, C = x_nhwc.shape
    assert H % 2 == 0 and W % 2 == 0
    Cout = w_taps.shape[-1]
    Ho, Wo = H // 2, W // 2
    Hp2, Wp2, C4 = Ho + 1, Wo + 1, 4 * C

    # pad + space-to-depth: (N,H,W,C) -> (N,Ho+1,Wo+1,4C).  Pure layout glue,
    # ~1x activation bytes (vs ~4x for a materialized im2col).
    xp = jnp.pad(x_nhwc, ((0, 0), (1, 1), (1, 1), (0, 0)))
    z = xp.reshape(N, Hp2, 2, Wp2, 2, C)
    z = jnp.transpose(z, (0, 1, 3, 2, 4, 5)).reshape(N, Hp2, Wp2, C4)
    z = z.astype(jnp.bfloat16)

    w_taps = w_taps.astype(jnp.bfloat16)
    bias2 = bias.astype(jnp.float32).reshape(1, Cout)

    grid = (N, Ho)
    row_spec0 = pl.BlockSpec((None, None, Wp2, C4), lambda n, r: (n, r, 0, 0))
    row_spec1 = pl.BlockSpec((None, None, Wp2, C4), lambda n, r: (n, r + 1, 0, 0))
    w_spec = pl.BlockSpec((4, C4, Cout), lambda n, r: (0, 0, 0))
    b_spec = pl.BlockSpec((1, Cout), lambda n, r: (0, 0))
    out_spec = pl.BlockSpec((None, None, Wo, Cout), lambda n, r: (n, r, 0, 0))
    cparams = pltpu.CompilerParams(
        dimension_semantics=("parallel", "parallel"))

    if not stats:
        return pl.pallas_call(
            functools.partial(_conv_s2d_lrelu_kernel, wo=Wo, alpha=alpha),
            out_shape=jax.ShapeDtypeStruct((N, Ho, Wo, Cout), out_dtype),
            grid=grid,
            in_specs=[row_spec0, row_spec1, w_spec, b_spec],
            out_specs=out_spec,
            compiler_params=cparams,
        )(z, z, w_taps, bias2)

    stat_spec = pl.BlockSpec((None, None, 1, Cout), lambda n, r: (n, r, 0, 0))
    return pl.pallas_call(
        functools.partial(_conv_s2d_stats_kernel, wo=Wo),
        out_shape=(
            jax.ShapeDtypeStruct((N, Ho, Wo, Cout), out_dtype),
            jax.ShapeDtypeStruct((N, Ho, 1, Cout), jnp.float32),
            jax.ShapeDtypeStruct((N, Ho, 1, Cout), jnp.float32),
        ),
        grid=grid,
        in_specs=[row_spec0, row_spec1, w_spec, b_spec],
        out_specs=[out_spec, stat_spec, stat_spec],
        compiler_params=cparams,
    )(z, z, w_taps, bias2)


def bn_lrelu_conv3_pool_sigmoid(y2, scale, shift, w3, b3, *, alpha=0.2):
    """Fused BatchNorm affine + LeakyReLU + conv3 + AdaptiveAvgPool2d(1) +
    Flatten + Sigmoid in a single pallas_call.  The mean pool is linear in the
    conv3 output, so conv3+pool collapse to a per-position effective weight
    keff[h, w, c]; zero-padded border positions (pad applied after LeakyReLU)
    contribute nothing, so the padded border is never materialized."""
    N, H2, W2, C2 = y2.shape
    H3, W3 = H2 // 2, W2 // 2
    Hp, Wp = H2 + 2, W2 + 2
    D = H2 * W2 * C2

    # Fold conv3 weight + pool into keff (weight-sized XLA work, done once).
    w3_t = jnp.transpose(w3[0].astype(jnp.float32), (1, 2, 0))   # (4, 4, C2)
    inv = 1.0 / float(H3 * W3)
    keff = jnp.zeros((Hp, Wp, C2), jnp.float32)
    for dy in range(4):
        my = np.zeros((Hp,), np.float32)
        my[dy:dy + 2 * H3:2] = 1.0
        for dx in range(4):
            mx = np.zeros((Wp,), np.float32)
            mx[dx:dx + 2 * W3:2] = 1.0
            keff = keff + (jnp.asarray(np.outer(my, mx) * inv)[:, :, None]
                           * w3_t[dy, dx][None, None, :])
    keff_flat = keff[1:H2 + 1, 1:W2 + 1, :].reshape(1, D)

    scale_flat = jnp.broadcast_to(scale.astype(jnp.float32)[None, None, :],
                                  (H2, W2, C2)).reshape(1, D)
    shift_flat = jnp.broadcast_to(shift.astype(jnp.float32)[None, None, :],
                                  (H2, W2, C2)).reshape(1, D)
    y2_flat = y2.reshape(N, D)
    b3_2d = jnp.reshape(b3.astype(jnp.float32), (1, 1))

    return pl.pallas_call(
        functools.partial(_head_kernel, alpha=alpha),
        out_shape=jax.ShapeDtypeStruct((N, 1), jnp.float32),
        grid=(1,),
        in_specs=[
            pl.BlockSpec((N, D), lambda i: (0, 0)),
            pl.BlockSpec((1, D), lambda i: (0, 0)),
            pl.BlockSpec((1, D), lambda i: (0, 0)),
            pl.BlockSpec((1, D), lambda i: (0, 0)),
            pl.BlockSpec((1, 1), lambda i: (0, 0)),
        ],
        out_specs=pl.BlockSpec((N, 1), lambda i: (0, 0)),
        compiler_params=pltpu.CompilerParams(
            dimension_semantics=("arbitrary",)),
    )(y2_flat, scale_flat, shift_flat, keff_flat, b3_2d)


# ---------------------------------------------------------------------------
# Parameters & forward
# ---------------------------------------------------------------------------
def init_params(key, input_channels, n_filters=64):
    """Deterministic params, PyTorch-style uniform(-1/sqrt(fan_in), +)."""
    def conv_init(k, cout, cin, ks):
        kw_, kb_ = jax.random.split(k)
        bound = 1.0 / jnp.sqrt(cin * ks * ks)
        w = jax.random.uniform(kw_, (cout, cin, ks, ks), jnp.float32, -bound, bound)
        b = jax.random.uniform(kb_, (cout,), jnp.float32, -bound, bound)
        return w, b

    k1, k2, k3 = jax.random.split(key, 3)
    w1, b1 = conv_init(k1, n_filters, input_channels, 4)
    w2, b2 = conv_init(k2, n_filters * 2, n_filters, 4)
    w3, b3 = conv_init(k3, 1, n_filters * 2, 4)
    gamma = jnp.ones((n_filters * 2,), jnp.float32)   # BN default init
    beta = jnp.zeros((n_filters * 2,), jnp.float32)
    return dict(w1=w1, b1=b1, w2=w2, b2=b2, w3=w3, b3=b3, gamma=gamma, beta=beta)


def discriminator_forward(params, img_nchw):
    """Pallas-backed forward. img_nchw: (N, C, H, W) -> (N, 1)."""
    x = jnp.transpose(img_nchw, (0, 2, 3, 1)).astype(jnp.bfloat16)  # NHWC bf16

    # Conv1 + LeakyReLU(0.2), fused epilogue.
    y1 = conv4x4_s2(x, conv_weight_taps(params["w1"]), params["b1"], alpha=0.2)

    # Conv2 with fused per-row BatchNorm statistics (training-mode batch stats).
    y2, csum, cssq = conv4x4_s2(y1, conv_weight_taps(params["w2"]),
                                params["b2"], stats=True)
    N, H2, W2, C2 = y2.shape
    m2 = N * H2 * W2
    mean = jnp.sum(csum, axis=(0, 1, 2)) / m2
    var = jnp.maximum(jnp.sum(cssq, axis=(0, 1, 2)) / m2 - mean * mean, 0.0)
    scale = params["gamma"] * lax.rsqrt(var + 1e-5)
    shift = params["beta"] - mean * scale

    # BN-normalize + LeakyReLU + conv3 + AdaptiveAvgPool + Sigmoid, one kernel.
    return bn_lrelu_conv3_pool_sigmoid(y2, scale, shift, params["w3"],
                                       params["b3"], alpha=0.2)


# ---------------------------------------------------------------------------
# Pure-JAX fp32 reference (for correctness check)
# ---------------------------------------------------------------------------
def reference_forward(params, img_nchw):
    x = img_nchw.astype(jnp.float32)

    def conv(x, w, b):
        y = lax.conv_general_dilated(x, w, window_strides=(2, 2),
                                     padding=((1, 1), (1, 1)),
                                     dimension_numbers=("NCHW", "OIHW", "NCHW"))
        return y + b[None, :, None, None]

    y = conv(x, params["w1"], params["b1"])
    y = jnp.where(y >= 0, y, 0.2 * y)
    y = conv(y, params["w2"], params["b2"])
    mean = y.mean(axis=(0, 2, 3), keepdims=True)
    var = y.var(axis=(0, 2, 3), keepdims=True)
    y = (y - mean) / jnp.sqrt(var + 1e-5)
    y = y * params["gamma"][None, :, None, None] + params["beta"][None, :, None, None]
    y = jnp.where(y >= 0, y, 0.2 * y)
    y = conv(y, params["w3"], params["b3"])
    y = y.mean(axis=(2, 3))            # (N, 1): AdaptiveAvgPool2d(1) + Flatten
    return jax.nn.sigmoid(y)


if __name__ == "__main__":
    key = jax.random.PRNGKey(0)
    k_param, k_img = jax.random.split(key)

    input_channels, n_filters = 4, 64
    N, H, W = 2, 16, 16
    params = init_params(k_param, input_channels, n_filters)
    img = jax.random.normal(k_img, (N, input_channels, H, W), jnp.float32)

    fwd = jax.jit(discriminator_forward)
    out = jax.block_until_ready(fwd(params, img))

    ref = jax.block_until_ready(reference_forward(params, img))
    assert out.shape == (N, 1), out.shape
    # bf16 MXU operands (fp32 accumulation/epilogues) -> loosened tolerance.
    assert jnp.allclose(out, ref, atol=2e-2, rtol=2e-2), (out, ref)

    print("KERNEL_OK")
</pallas_src>

<mosaic_0001>
module attributes {stable_mosaic.version = 11 : i64} {
  func.func @_conv_s2d_lrelu_kernel(%arg0: i32, %arg1: i32, %arg2: memref<1x1x9x16xbf16, #tpu.memory_space<vmem>>, %arg3: memref<1x1x9x16xbf16, #tpu.memory_space<vmem>>, %arg4: memref<4x16x64xbf16, #tpu.memory_space<vmem>>, %arg5: memref<1x64xf32, #tpu.memory_space<vmem>>, %arg6: memref<1x1x8x64xbf16, #tpu.memory_space<vmem>>) attributes {dimension_semantics = [#tpu.dimension_semantics<parallel>, #tpu.dimension_semantics<parallel>], iteration_bounds = array<i64: 2, 8>, scalar_prefetch = 0 : i64, scratch_operands = 0 : i64, tpu.core_type = #tpu.core_type<tc>, window_params = [{transform_indices = @transform_0, window_bounds = array<i64: 1, 1, 9, 16>}, {transform_indices = @transform_1, window_bounds = array<i64: 1, 1, 9, 16>}, {pipeline_mode = #tpu.pipeline_mode<synchronous>, transform_indices = @transform_2, window_bounds = array<i64: 4, 16, 64>}, {pipeline_mode = #tpu.pipeline_mode<synchronous>, transform_indices = @transform_3, window_bounds = array<i64: 1, 64>}, {transform_indices = @transform_4, window_bounds = array<i64: 1, 1, 8, 64>}]} {
    %c0 = arith.constant 0 : index
    %c0_0 = arith.constant 0 : index
    %c0_1 = arith.constant 0 : index
    %c0_2 = arith.constant 0 : index
    %0 = vector.load %arg2[%c0, %c0_0, %c0_1, %c0_2] : memref<1x1x9x16xbf16, #tpu.memory_space<vmem>>, vector<1x1x8x16xbf16>
    %1 = vector.shape_cast %0 : vector<1x1x8x16xbf16> to vector<8x16xbf16>
    %c0_3 = arith.constant 0 : index
    %c0_4 = arith.constant 0 : index
    %c0_5 = arith.constant 0 : index
    %2 = vector.load %arg4[%c0_3, %c0_4, %c0_5] : memref<4x16x64xbf16, #tpu.memory_space<vmem>>, vector<1x16x64xbf16>
    %3 = vector.shape_cast %2 : vector<1x16x64xbf16> to vector<16x64xbf16>
    %cst = arith.constant dense<0.000000e+00> : vector<8x64xf32>
    %4 = tpu.matmul %1, %3, %cst {dimension_numbers = #tpu.dot_dimension_numbers<[1], [0], [0], [1], [0, 0, 1, 1], [], []>} : vector<8x16xbf16>, vector<16x64xbf16>, vector<8x64xf32> -> vector<8x64xf32>
    %c0_6 = arith.constant 0 : index
    %c0_7 = arith.constant 0 : index
    %c1 = arith.constant 1 : index
    %c0_8 = arith.constant 0 : index
    %5 = vector.load %arg2[%c0_6, %c0_7, %c1, %c0_8] : memref<1x1x9x16xbf16, #tpu.memory_space<vmem>>, vector<1x1x8x16xbf16>
    %6 = vector.shape_cast %5 : vector<1x1x8x16xbf16> to vector<8x16xbf16>
    %c1_9 = arith.constant 1 : index
    %c0_10 = arith.constant 0 : index
    %c0_11 = arith.constant 0 : index
    %7 = vector.load %arg4[%c1_9, %c0_10, %c0_11] : memref<4x16x64xbf16, #tpu.memory_space<vmem>>, vector<1x16x64xbf16>
    %8 = vector.shape_cast %7 : vector<1x16x64xbf16> to vector<16x64xbf16>
    %cst_12 = arith.constant dense<0.000000e+00> : vector<8x64xf32>
    %9 = tpu.matmul %6, %8, %cst_12 {dimension_numbers = #tpu.dot_dimension_numbers<[1], [0], [0], [1], [0, 0, 1, 1], [], []>} : vector<8x16xbf16>, vector<16x64xbf16>, vector<8x64xf32> -> vector<8x64xf32>
    %10 = arith.addf %4, %9 : vector<8x64xf32>
    %c0_13 = arith.constant 0 : index
    %c0_14 = arith.constant 0 : index
    %c0_15 = arith.constant 0 : index
    %c0_16 = arith.constant 0 : index
    %11 = vector.load %arg3[%c0_13, %c0_14, %c0_15, %c0_16] : memref<1x1x9x16xbf16, #tpu.memory_space<vmem>>, vector<1x1x8x16xbf16>
    %12 = vector.shape_cast %11 : vector<1x1x8x16xbf16> to vector<8x16xbf16>
    %c2 = arith.constant 2 : index
    %c0_17 = arith.constant 0 : index
    %c0_18 = arith.constant 0 : index
    %13 = vector.load %arg4[%c2, %c0_17, %c0_18] : memref<4x16x64xbf16, #tpu.memory_space<vmem>>, vector<1x16x64xbf16>
    %14 = vector.shape_cast %13 : vector<1x16x64xbf16> to vector<16x64xbf16>
    %cst_19 = arith.constant dense<0.000000e+00> : vector<8x64xf32>
    %15 = tpu.matmul %12, %14, %cst_19 {dimension_numbers = #tpu.dot_dimension_numbers<[1], [0], [0], [1], [0, 0, 1, 1], [], []>} : vector<8x16xbf16>, vector<16x64xbf16>, vector<8x64xf32> -> vector<8x64xf32>
    %16 = arith.addf %10, %15 : vector<8x64xf32>
    %c0_20 = arith.constant 0 : index
    %c0_21 = arith.constant 0 : index
    %c1_22 = arith.constant 1 : index
    %c0_23 = arith.constant 0 : index
    %17 = vector.load %arg3[%c0_20, %c0_21, %c1_22, %c0_23] : memref<1x1x9x16xbf16, #tpu.memory_space<vmem>>, vector<1x1x8x16xbf16>
    %18 = vector.shape_cast %17 : vector<1x1x8x16xbf16> to vector<8x16xbf16>
    %c3 = arith.constant 3 : index
    %c0_24 = arith.constant 0 : index
    %c0_25 = arith.constant 0 : index
    %19 = vector.load %arg4[%c3, %c0_24, %c0_25] : memref<4x16x64xbf16, #tpu.memory_space<vmem>>, vector<1x16x64xbf16>
    %20 = vector.shape_cast %19 : vector<1x16x64xbf16> to vector<16x64xbf16>
    %cst_26 = arith.constant dense<0.000000e+00> : vector<8x64xf32>
    %21 = tpu.matmul %18, %20, %cst_26 {dimension_numbers = #tpu.dot_dimension_numbers<[1], [0], [0], [1], [0, 0, 1, 1], [], []>} : vector<8x16xbf16>, vector<16x64xbf16>, vector<8x64xf32> -> vector<8x64xf32>
    %22 = arith.addf %16, %21 : vector<8x64xf32>
    %c0_27 = arith.constant 0 : index
    %c0_28 = arith.constant 0 : index
    %23 = vector.load %arg5[%c0_27, %c0_28] : memref<1x64xf32, #tpu.memory_space<vmem>>, vector<1x64xf32>
    %24 = vector.broadcast %23 : vector<1x64xf32> to vector<8x64xf32>
    %25 = arith.addf %22, %24 : vector<8x64xf32>
    %cst_29 = arith.constant 0.000000e+00 : f32
    %26 = vector.broadcast %cst_29 : f32 to vector<8x64xf32>
    %27 = arith.cmpf oge, %25, %26 : vector<8x64xf32>
    %cst_30 = arith.constant 2.000000e-01 : f32
    %28 = vector.broadcast %cst_30 : f32 to vector<8x64xf32>
    %29 = arith.mulf %28, %25 : vector<8x64xf32>
    %30 = arith.select %27, %25, %29 : vector<8x64xi1>, vector<8x64xf32>
    %31 = arith.truncf %30 : vector<8x64xf32> to vector<8x64xbf16>
    %c0_31 = arith.constant 0 : index
    %c0_32 = arith.constant 0 : index
    %c0_33 = arith.constant 0 : index
    %c0_34 = arith.constant 0 : index
    %32 = vector.load %arg6[%c0_31, %c0_32, %c0_33, %c0_34] : memref<1x1x8x64xbf16, #tpu.memory_space<vmem>>, vector<1x1x8x64xbf16>
    %33 = vector.shape_cast %32 : vector<1x1x8x64xbf16> to vector<8x64xbf16>
    %34 = vector.shape_cast %31 : vector<8x64xbf16> to vector<1x1x8x64xbf16>
    tpu.vector_store %arg6[%c0_31, %c0_32, %c0_33, %c0_34], %34 {strides = array<i32>} : memref<1x1x8x64xbf16, #tpu.memory_space<vmem>>, vector<1x1x8x64xbf16>,
    return
  }
  func.func @transform_0(%arg0: i32, %arg1: i32) -> (i32, i32, i32, i32) {
    %c0_i32 = arith.constant 0 : i32
    %c0_i32_0 = arith.constant 0 : i32
    %c0_i32_1 = arith.constant 0 : i32
    return %arg0, %arg1, %c0_i32, %c0_i32_0 : i32, i32, i32, i32
  }
  func.func @transform_1(%arg0: i32, %arg1: i32) -> (i32, i32, i32, i32) {
    %c1_i32 = arith.constant 1 : i32
    %0 = arith.addi %arg1, %c1_i32 : i32
    %c0_i32 = arith.constant 0 : i32
    %c0_i32_0 = arith.constant 0 : i32
    %c0_i32_1 = arith.constant 0 : i32
    return %arg0, %0, %c0_i32, %c0_i32_0 : i32, i32, i32, i32
  }
  func.func @transform_2(%arg0: i32, %arg1: i32) -> (i32, i32, i32) {
    %c0_i32 = arith.constant 0 : i32
    %c0_i32_0 = arith.constant 0 : i32
    %c0_i32_1 = arith.constant 0 : i32
    %c0_i32_2 = arith.constant 0 : i32
    return %c0_i32, %c0_i32_0, %c0_i32_1 : i32, i32, i32
  }
  func.func @transform_3(%arg0: i32, %arg1: i32) -> (i32, i32) {
    %c0_i32 = arith.constant 0 : i32
    %c0_i32_0 = arith.constant 0 : i32
    %c0_i32_1 = arith.constant 0 : i32
    return %c0_i32, %c0_i32_0 : i32, i32
  }
  func.func @transform_4(%arg0: i32, %arg1: i32) -> (i32, i32, i32, i32) {
    %c0_i32 = arith.constant 0 : i32
    %c0_i32_0 = arith.constant 0 : i32
    %c0_i32_1 = arith.constant 0 : i32
    return %arg0, %arg1, %c0_i32, %c0_i32_0 : i32, i32, i32, i32
  }
}

module attributes {stable_mosaic.version = 11 : i64} {
  func.func @_conv_s2d_stats_kernel(%arg0: i32, %arg1: i32, %arg2: memref<1x1x5x256xbf16, #tpu.memory_space<vmem>>, %arg3: memref<1x1x5x256xbf16, #tpu.memory_space<vmem>>, %arg4: memref<4x256x128xbf16, #tpu.memory_space<vmem>>, %arg5: memref<1x128xf32, #tpu.memory_space<vmem>>, %arg6: memref<1x1x4x128xbf16, #tpu.memory_space<vmem>>, %arg7: memref<1x1x1x128xf32, #tpu.memory_space<vmem>>, %arg8: memref<1x1x1x128xf32, #tpu.memory_space<vmem>>) attributes {dimension_semantics = [#tpu.dimension_semantics<parallel>, #tpu.dimension_semantics<parallel>], iteration_bounds = array<i64: 2, 4>, scalar_prefetch = 0 : i64, scratch_operands = 0 : i64, tpu.core_type = #tpu.core_type<tc>, window_params = [{transform_indices = @transform_0, window_bounds = array<i64: 1, 1, 5, 256>}, {transform_indices = @transform_1, window_bounds = array<i64: 1, 1, 5, 256>}, {pipeline_mode = #tpu.pipeline_mode<synchronous>, transform_indices = @transform_2, window_bounds = array<i64: 4, 256, 128>}, {pipeline_mode = #tpu.pipeline_mode<synchronous>, transform_indices = @transform_3, window_bounds = array<i64: 1, 128>}, {transform_indices = @transform_4, window_bounds = array<i64: 1, 1, 4, 128>}, {transform_indices = @transform_5, window_bounds = array<i64: 1, 1, 1, 128>}, {transform_indices = @transform_6, window_bounds = array<i64: 1, 1, 1, 128>}]} {
    %c0 = arith.constant 0 : index
    %c0_0 = arith.constant 0 : index
    %c0_1 = arith.constant 0 : index
    %c0_2 = arith.constant 0 : index
    %0 = vector.load %arg2[%c0, %c0_0, %c0_1, %c0_2] : memref<1x1x5x256xbf16, #tpu.memory_space<vmem>>, vector<1x1x4x256xbf16>
    %1 = vector.shape_cast %0 : vector<1x1x4x256xbf16> to vector<4x256xbf16>
    %c0_3 = arith.constant 0 : index
    %c0_4 = arith.constant 0 : index
    %c0_5 = arith.constant 0 : index
    %2 = vector.load %arg4[%c0_3, %c0_4, %c0_5] : memref<4x256x128xbf16, #tpu.memory_space<vmem>>, vector<1x256x128xbf16>
    %3 = vector.shape_cast %2 : vector<1x256x128xbf16> to vector<256x128xbf16>
    %cst = arith.constant dense<0.000000e+00> : vector<4x128xf32>
    %4 = tpu.matmul %1, %3, %cst {dimension_numbers = #tpu.dot_dimension_numbers<[1], [0], [0], [1], [0, 0, 1, 1], [], []>} : vector<4x256xbf16>, vector<256x128xbf16>, vector<4x128xf32> -> vector<4x128xf32>
    %c0_6 = arith.constant 0 : index
    %c0_7 = arith.constant 0 : index
    %c1 = arith.constant 1 : index
    %c0_8 = arith.constant 0 : index
    %5 = vector.load %arg2[%c0_6, %c0_7, %c1, %c0_8] : memref<1x1x5x256xbf16, #tpu.memory_space<vmem>>, vector<1x1x4x256xbf16>
    %6 = vector.shape_cast %5 : vector<1x1x4x256xbf16> to vector<4x256xbf16>
    %c1_9 = arith.constant 1 : index
    %c0_10 = arith.constant 0 : index
    %c0_11 = arith.constant 0 : index
    %7 = vector.load %arg4[%c1_9, %c0_10, %c0_11] : memref<4x256x128xbf16, #tpu.memory_space<vmem>>, vector<1x256x128xbf16>
    %8 = vector.shape_cast %7 : vector<1x256x128xbf16> to vector<256x128xbf16>
    %cst_12 = arith.constant dense<0.000000e+00> : vector<4x128xf32>
    %9 = tpu.matmul %6, %8, %cst_12 {dimension_numbers = #tpu.dot_dimension_numbers<[1], [0], [0], [1], [0, 0, 1, 1], [], []>} : vector<4x256xbf16>, vector<256x128xbf16>, vector<4x128xf32> -> vector<4x128xf32>
    %10 = arith.addf %4, %9 : vector<4x128xf32>
    %c0_13 = arith.constant 0 : index
    %c0_14 = arith.constant 0 : index
    %c0_15 = arith.constant 0 : index
    %c0_16 = arith.constant 0 : index
    %11 = vector.load %arg3[%c0_13, %c0_14, %c0_15, %c0_16] : memref<1x1x5x256xbf16, #tpu.memory_space<vmem>>, vector<1x1x4x256xbf16>
    %12 = vector.shape_cast %11 : vector<1x1x4x256xbf16> to vector<4x256xbf16>
    %c2 = arith.constant 2 : index
    %c0_17 = arith.constant 0 : index
    %c0_18 = arith.constant 0 : index
    %13 = vector.load %arg4[%c2, %c0_17, %c0_18] : memref<4x256x128xbf16, #tpu.memory_space<vmem>>, vector<1x256x128xbf16>
    %14 = vector.shape_cast %13 : vector<1x256x128xbf16> to vector<256x128xbf16>
    %cst_19 = arith.constant dense<0.000000e+00> : vector<4x128xf32>
    %15 = tpu.matmul %12, %14, %cst_19 {dimension_numbers = #tpu.dot_dimension_numbers<[1], [0], [0], [1], [0, 0, 1, 1], [], []>} : vector<4x256xbf16>, vector<256x128xbf16>, vector<4x128xf32> -> vector<4x128xf32>
    %16 = arith.addf %10, %15 : vector<4x128xf32>
    %c0_20 = arith.constant 0 : index
    %c0_21 = arith.constant 0 : index
    %c1_22 = arith.constant 1 : index
    %c0_23 = arith.constant 0 : index
    %17 = vector.load %arg3[%c0_20, %c0_21, %c1_22, %c0_23] : memref<1x1x5x256xbf16, #tpu.memory_space<vmem>>, vector<1x1x4x256xbf16>
    %18 = vector.shape_cast %17 : vector<1x1x4x256xbf16> to vector<4x256xbf16>
    %c3 = arith.constant 3 : index
    %c0_24 = arith.constant 0 : index
    %c0_25 = arith.constant 0 : index
    %19 = vector.load %arg4[%c3, %c0_24, %c0_25] : memref<4x256x128xbf16, #tpu.memory_space<vmem>>, vector<1x256x128xbf16>
    %20 = vector.shape_cast %19 : vector<1x256x128xbf16> to vector<256x128xbf16>
    %cst_26 = arith.constant dense<0.000000e+00> : vector<4x128xf32>
    %21 = tpu.matmul %18, %20, %cst_26 {dimension_numbers = #tpu.dot_dimension_numbers<[1], [0], [0], [1], [0, 0, 1, 1], [], []>} : vector<4x256xbf16>, vector<256x128xbf16>, vector<4x128xf32> -> vector<4x128xf32>
    %22 = arith.addf %16, %21 : vector<4x128xf32>
    %c0_27 = arith.constant 0 : index
    %c0_28 = arith.constant 0 : index
    %23 = vector.load %arg5[%c0_27, %c0_28] : memref<1x128xf32, #tpu.memory_space<vmem>>, vector<1x128xf32>
    %24 = vector.broadcast %23 : vector<1x128xf32> to vector<4x128xf32>
    %25 = arith.addf %22, %24 : vector<4x128xf32>
    %26 = arith.truncf %25 : vector<4x128xf32> to vector<4x128xbf16>
    %c0_29 = arith.constant 0 : index
    %c0_30 = arith.constant 0 : index
    %c0_31 = arith.constant 0 : index
    %c0_32 = arith.constant 0 : index
    %27 = vector.load %arg6[%c0_29, %c0_30, %c0_31, %c0_32] : memref<1x1x4x128xbf16, #tpu.memory_space<vmem>>, vector<1x1x4x128xbf16>
    %28 = vector.shape_cast %27 : vector<1x1x4x128xbf16> to vector<4x128xbf16>
    %29 = vector.shape_cast %26 : vector<4x128xbf16> to vector<1x1x4x128xbf16>
    tpu.vector_store %arg6[%c0_29, %c0_30, %c0_31, %c0_32], %29 {strides = array<i32>} : memref<1x1x4x128xbf16, #tpu.memory_space<vmem>>, vector<1x1x4x128xbf16>,
    %cst_33 = arith.constant dense<0.000000e+00> : vector<128xf32>
    %30 = vector.multi_reduction <add>, %25, %cst_33 [0] : vector<4x128xf32> to vector<128xf32>
    %31 = vector.shape_cast %30 : vector<128xf32> to vector<1x128xf32>
    %c0_34 = arith.constant 0 : index
    %c0_35 = arith.constant 0 : index
    %c0_36 = arith.constant 0 : index
    %c0_37 = arith.constant 0 : index
    %32 = vector.load %arg7[%c0_34, %c0_35, %c0_36, %c0_37] : memref<1x1x1x128xf32, #tpu.memory_space<vmem>>, vector<1x1x1x128xf32>
    %33 = vector.shape_cast %32 : vector<1x1x1x128xf32> to vector<1x128xf32>
    %34 = vector.shape_cast %31 : vector<1x128xf32> to vector<1x1x1x128xf32>
    tpu.vector_store %arg7[%c0_34, %c0_35, %c0_36, %c0_37], %34 {strides = array<i32>} : memref<1x1x1x128xf32, #tpu.memory_space<vmem>>, vector<1x1x1x128xf32>,
    %35 = arith.mulf %25, %25 : vector<4x128xf32>
    %cst_38 = arith.constant dense<0.000000e+00> : vector<128xf32>
    %36 = vector.multi_reduction <add>, %35, %cst_38 [0] : vector<4x128xf32> to vector<128xf32>
    %37 = vector.shape_cast %36 : vector<128xf32> to vector<1x128xf32>
    %c0_39 = arith.constant 0 : index
    %c0_40 = arith.constant 0 : index
    %c0_41 = arith.constant 0 : index
    %c0_42 = arith.constant 0 : index
    %38 = vector.load %arg8[%c0_39, %c0_40, %c0_41, %c0_42] : memref<1x1x1x128xf32, #tpu.memory_space<vmem>>, vector<1x1x1x128xf32>
    %39 = vector.shape_cast %38 : vector<1x1x1x128xf32> to vector<1x128xf32>
    %40 = vector.shape_cast %37 : vector<1x128xf32> to vector<1x1x1x128xf32>
    tpu.vector_store %arg8[%c0_39, %c0_40, %c0_41, %c0_42], %40 {strides = array<i32>} : memref<1x1x1x128xf32, #tpu.memory_space<vmem>>, vector<1x1x1x128xf32>,
    return
  }
  func.func @transform_0(%arg0: i32, %arg1: i32) -> (i32, i32, i32, i32) {
    %c0_i32 = arith.constant 0 : i32
    %c0_i32_0 = arith.constant 0 : i32
    %c0_i32_1 = arith.constant 0 : i32
    return %arg0, %arg1, %c0_i32, %c0_i32_0 : i32, i32, i32, i32
  }
  func.func @transform_1(%arg0: i32, %arg1: i32) -> (i32, i32, i32, i32) {
    %c1_i32 = arith.constant 1 : i32
    %0 = arith.addi %arg1, %c1_i32 : i32
    %c0_i32 = arith.constant 0 : i32
    %c0_i32_0 = arith.constant 0 : i32
    %c0_i32_1 = arith.constant 0 : i32
    return %arg0, %0, %c0_i32, %c0_i32_0 : i32, i32, i32, i32
  }
  func.func @transform_2(%arg0: i32, %arg1: i32) -> (i32, i32, i32) {
    %c0_i32 = arith.constant 0 : i32
    %c0_i32_0 = arith.constant 0 : i32
    %c0_i32_1 = arith.constant 0 : i32
    %c0_i32_2 = arith.constant 0 : i32
    return %c0_i32, %c0_i32_0, %c0_i32_1 : i32, i32, i32
  }
  func.func @transform_3(%arg0: i32, %arg1: i32) -> (i32, i32) {
    %c0_i32 = arith.constant 0 : i32
    %c0_i32_0 = arith.constant 0 : i32
    %c0_i32_1 = arith.constant 0 : i32
    return %c0_i32, %c0_i32_0 : i32, i32
  }
  func.func @transform_4(%arg0: i32, %arg1: i32) -> (i32, i32, i32, i32) {
    %c0_i32 = arith.constant 0 : i32
    %c0_i32_0 = arith.constant 0 : i32
    %c0_i32_1 = arith.constant 0 : i32
    return %arg0, %arg1, %c0_i32, %c0_i32_0 : i32, i32, i32, i32
  }
  func.func @transform_5(%arg0: i32, %arg1: i32) -> (i32, i32, i32, i32) {
    %c0_i32 = arith.constant 0 : i32
    %c0_i32_0 = arith.constant 0 : i32
    %c0_i32_1 = arith.constant 0 : i32
    return %arg0, %arg1, %c0_i32, %c0_i32_0 : i32, i32, i32, i32
  }
  func.func @transform_6(%arg0: i32, %arg1: i32) -> (i32, i32, i32, i32) {
    %c0_i32 = arith.constant 0 : i32
    %c0_i32_0 = arith.constant 0 : i32
    %c0_i32_1 = arith.constant 0 : i32
    return %arg0, %arg1, %c0_i32, %c0_i32_0 : i32, i32, i32, i32
  }
}

module attributes {stable_mosaic.version = 11 : i64} {
  func.func @_head_kernel(%arg0: i32, %arg1: memref<2x2048xbf16, #tpu.memory_space<vmem>>, %arg2: memref<1x2048xf32, #tpu.memory_space<vmem>>, %arg3: memref<1x2048xf32, #tpu.memory_space<vmem>>, %arg4: memref<1x2048xf32, #tpu.memory_space<vmem>>, %arg5: memref<1x1xf32, #tpu.memory_space<vmem>>, %arg6: memref<2x1xf32, #tpu.memory_space<vmem>>) attributes {dimension_semantics = [#tpu.dimension_semantics<arbitrary>], iteration_bounds = array<i64: 1>, scalar_prefetch = 0 : i64, scratch_operands = 0 : i64, tpu.core_type = #tpu.core_type<tc>, window_params = [{pipeline_mode = #tpu.pipeline_mode<synchronous>, transform_indices = @transform_0, window_bounds = array<i64: 2, 2048>}, {pipeline_mode = #tpu.pipeline_mode<synchronous>, transform_indices = @transform_1, window_bounds = array<i64: 1, 2048>}, {pipeline_mode = #tpu.pipeline_mode<synchronous>, transform_indices = @transform_2, window_bounds = array<i64: 1, 2048>}, {pipeline_mode = #tpu.pipeline_mode<synchronous>, transform_indices = @transform_3, window_bounds = array<i64: 1, 2048>}, {pipeline_mode = #tpu.pipeline_mode<synchronous>, transform_indices = @transform_4, window_bounds = array<i64: 1, 1>}, {pipeline_mode = #tpu.pipeline_mode<synchronous>, transform_indices = @transform_5, window_bounds = array<i64: 2, 1>}]} {
    %c0 = arith.constant 0 : index
    %c0_0 = arith.constant 0 : index
    %0 = vector.load %arg1[%c0, %c0_0] : memref<2x2048xbf16, #tpu.memory_space<vmem>>, vector<2x2048xbf16>
    %1 = arith.extf %0 : vector<2x2048xbf16> to vector<2x2048xf32>
    %c0_1 = arith.constant 0 : index
    %c0_2 = arith.constant 0 : index
    %2 = vector.load %arg2[%c0_1, %c0_2] : memref<1x2048xf32, #tpu.memory_space<vmem>>, vector<1x2048xf32>
    %3 = vector.broadcast %2 : vector<1x2048xf32> to vector<2x2048xf32>
    %4 = arith.mulf %1, %3 : vector<2x2048xf32>
    %c0_3 = arith.constant 0 : index
    %c0_4 = arith.constant 0 : index
    %5 = vector.load %arg3[%c0_3, %c0_4] : memref<1x2048xf32, #tpu.memory_space<vmem>>, vector<1x2048xf32>
    %6 = vector.broadcast %5 : vector<1x2048xf32> to vector<2x2048xf32>
    %7 = arith.addf %4, %6 : vector<2x2048xf32>
    %cst = arith.constant 0.000000e+00 : f32
    %8 = vector.broadcast %cst : f32 to vector<2x2048xf32>
    %9 = arith.cmpf oge, %7, %8 : vector<2x2048xf32>
    %cst_5 = arith.constant 2.000000e-01 : f32
    %10 = vector.broadcast %cst_5 : f32 to vector<2x2048xf32>
    %11 = arith.mulf %10, %7 : vector<2x2048xf32>
    %12 = arith.select %9, %7, %11 : vector<2x2048xi1>, vector<2x2048xf32>
    %c0_6 = arith.constant 0 : index
    %c0_7 = arith.constant 0 : index
    %13 = vector.load %arg4[%c0_6, %c0_7] : memref<1x2048xf32, #tpu.memory_space<vmem>>, vector<1x2048xf32>
    %14 = vector.broadcast %13 : vector<1x2048xf32> to vector<2x2048xf32>
    %15 = arith.mulf %12, %14 : vector<2x2048xf32>
    %cst_8 = arith.constant dense<0.000000e+00> : vector<2xf32>
    %16 = vector.multi_reduction <add>, %15, %cst_8 [1] : vector<2x2048xf32> to vector<2xf32>
    %17 = vector.shape_cast %16 : vector<2xf32> to vector<2x1xf32>
    %c0_9 = arith.constant 0 : index
    %c0_10 = arith.constant 0 : index
    %18 = vector.load %arg5[%c0_9, %c0_10] : memref<1x1xf32, #tpu.memory_space<vmem>>, vector<1x1xf32>
    %19 = vector.broadcast %18 : vector<1x1xf32> to vector<2x1xf32>
    %20 = arith.addf %17, %19 : vector<2x1xf32>
    %cst_11 = arith.constant 0.000000e+00 : f32
    %21 = vector.broadcast %cst_11 : f32 to vector<2x1xf32>
    %22 = arith.subf %21, %20 : vector<2x1xf32>
    %23 = math.exp %22 : vector<2x1xf32>
    %cst_12 = arith.constant 1.000000e+00 : f32
    %24 = vector.broadcast %cst_12 : f32 to vector<2x1xf32>
    %25 = arith.addf %24, %23 : vector<2x1xf32>
    %cst_13 = arith.constant 1.000000e+00 : f32
    %26 = vector.broadcast %cst_13 : f32 to vector<2x1xf32>
    %27 = arith.divf %26, %25 : vector<2x1xf32>
    %c0_14 = arith.constant 0 : index
    %c0_15 = arith.constant 0 : index
    %28 = vector.load %arg6[%c0_14, %c0_15] : memref<2x1xf32, #tpu.memory_space<vmem>>, vector<2x1xf32>
    tpu.vector_store %arg6[%c0_14, %c0_15], %27 {strides = array<i32>} : memref<2x1xf32, #tpu.memory_space<vmem>>, vector<2x1xf32>,
    return
  }
  func.func @transform_0(%arg0: i32) -> (i32, i32) {
    %c0_i32 = arith.constant 0 : i32
    %c0_i32_0 = arith.constant 0 : i32
    %c0_i32_1 = arith.constant 0 : i32
    return %c0_i32, %c0_i32_0 : i32, i32
  }
  func.func @transform_1(%arg0: i32) -> (i32, i32) {
    %c0_i32 = arith.constant 0 : i32
    %c0_i32_0 = arith.constant 0 : i32
    %c0_i32_1 = arith.constant 0 : i32
    return %c0_i32, %c0_i32_0 : i32, i32
  }
  func.func @transform_2(%arg0: i32) -> (i32, i32) {
    %c0_i32 = arith.constant 0 : i32
    %c0_i32_0 = arith.constant 0 : i32
    %c0_i32_1 = arith.constant 0 : i32
    return %c0_i32, %c0_i32_0 : i32, i32
  }
  func.func @transform_3(%arg0: i32) -> (i32, i32) {
    %c0_i32 = arith.constant 0 : i32
    %c0_i32_0 = arith.constant 0 : i32
    %c0_i32_1 = arith.constant 0 : i32
    return %c0_i32, %c0_i32_0 : i32, i32
  }
  func.func @transform_4(%arg0: i32) -> (i32, i32) {
    %c0_i32 = arith.constant 0 : i32
    %c0_i32_0 = arith.constant 0 : i32
    %c0_i32_1 = arith.constant 0 : i32
    return %c0_i32, %c0_i32_0 : i32, i32
  }
  func.func @transform_5(%arg0: i32) -> (i32, i32) {
    %c0_i32 = arith.constant 0 : i32
    %c0_i32_0 = arith.constant 0 : i32
    %c0_i32_1 = arith.constant 0 : i32
    return %c0_i32, %c0_i32_0 : i32, i32
  }
}

</mosaic_0001>

<bundles_post_ra>
// kernel: discriminator_forward.3
= control target key start
LH: loop header
LB: loop body
LE: loop exit
PB: predicated region body
PF: predicated region fallthrough
CT: control target
= control target key end

     0   :  { %s815_s15 = smov 0   ;;  %s817_s16 = smov 0   ;;  %s903_s0 = inlined_call_operand.vmem [shape: bf16[2,9,9,16], index: 0, kind: input, shape index: {}, may-alias: {0,1}]   ;;  %s904_s1 = inlined_call_operand.vmem [shape: bf16[2,9,9,16], index: 1, kind: input, shape index: {}, may-alias: {0,1}]   ;;  %s905_s2 = inlined_call_operand.vmem [shape: bf16[4,16,64], index: 2, kind: input, shape index: {}]   ;;  %s906_s3 = inlined_call_operand.vmem [shape: f32[1,64], index: 3, kind: input, shape index: {}]   ;;  %s907_s4 = inlined_call_operand.vmem [shape: bf16[2,8,8,64], index: 4, kind: output, shape index: {}]  }
   0x1   :  { %s819_s17 = smov 0   ;;  %s821_s18 = smov 0  }
   0x2   :  { %s823_s19 = smov 0  }
   0x3 LB: > { %s23_s20 = sadd.s32 1, %s778_s17  ;;  %s26_s21 = sadd.s32 1, %s782_s18  ;;  %s786_s19 = sphi %s823_s19, %s14_s19   ;;  %s782_s18 = sphi %s821_s18, %s911_s18   ;;  %s778_s17 = sphi %s819_s17, %s910_s17   ;;  %s774_s16 = sphi %s817_s16, %s909_s16   ;;  %s770_s15 = sphi %s815_s15, %s908_s15  }
   0x4   : > { %p24_p0 = scmp.ge.s32.totalorder %s23_s20, 8  ;;  %p641_p1 = scmp.ge.s32.totalorder %s786_s19, 1 }
   0x5   : > { %p202_p2 = scmp.lt.s32.totalorder %s786_s19, 17 }
   0x6   : > { %s913_s20 = smov (%p24_p0, %s23_s20), 0  ;;  %s915_s21 = smov (!%p24_p0, %s26_s21), %s782_s18 }
   0x7   : > { %p203_p3 = pnand %p641_p1, %p202_p2  ;;  %p28_p4 = scmp.ge.s32.totalorder %s915_s21, 2 }
   0x8   : > { %p245_p5 = scmp.lt.s32.totalorder (!%p203_p3), %s774_s16, 1  ;;  %p247_p6 = scmp.lt.s32.totalorder (!%p203_p3), %s770_s15, 8 }
   0x9   : > { %s917_s21 = smov (%p28_p4, %s915_s21), 0  ;;  %206 = sbr.rel (%p203_p3) target bundleno = 243 (0xf3), region = 36 }
   0xa   : > { %s254_s26 = sadd.s32 (!%p203_p3), 1, %s770_s15  ;;  %p267_p8 = scmp.lt.s32.totalorder (!%p203_p3), %s770_s15, 7 }
   0xb   : > { %p257_p7 = scmp.lt.s32.totalorder (!%p203_p3), %s254_s26, 8 }
   0xe   : > { %v742_v0 = vld [vmem:[%s905_s2] sm:$0xff]   ;;  %v788_v1 = vmov 0.0   ;;  %v743_v2 = vld [vmem:[%s905_s2 + $0x8] sm:$0xff]   ;;  %vm789_vm0 = vmmov 0   ;;  %s919_s16 = smov (!%p245_p5, %s774_s16), 1  ;;  %vm299_vm1 = vcmask 130048  }
   0xf   : > { %681 = vmatprep.subr.bf16.mxu1 %v788_v1  ;;  %675 = vmatprep.subr.bf16.mxu0 %v788_v1  ;;  %s248_s27 = scalar_select %p247_p6, %s770_s15, 8  ;;  %v747_v3 = vld [vmem:[%s905_s2 + $0x18] sm:$0xff]   ;;  %v746_v10 = vld [vmem:[%s905_s2 + $0x10] sm:$0xff]   ;;  %v664_v32 = vld [vmem:[%s906_s3] ss:$0 sm:$0xff]  ;;  %vm525_vm3 = vcmask 519168  }
  0x10   : > { %682 = vmatpush3.bf16.msra.mxu1 %v742_v0  ;;  %683 = vmatprep.mubr.msk.bf16.mxu1 %vm789_vm0, %v788_v1  ;;  %s699_s28 = smul.u32 18, %s919_s16  ;;  %s921_s26 = smov (!%p257_p7, %s254_s26), 8 }
  0x11   : > { %676 = vmatpush3.bf16.msra.mxu0 %v743_v2  ;;  %677 = vmatprep.mubr.msk.bf16.mxu0 %vm789_vm0, %v788_v1  ;;  %s642_s29 = sshll.u32 %s248_s27, 1  ;;  %s644_s11 = sshll.u32 %s921_s26, 1 }
  0x12   : > { %687 = vmatprep.subr.bf16.mxu0 %v788_v1  ;;  %693 = vmatprep.subr.bf16.mxu1 %v788_v1  ;;  %s251_s30 = sadd.s32 %s699_s28, %s642_s29  ;;  %s261_s12 = sadd.s32 %s699_s28, %s644_s11 }
  0x13   : > { %s643_s5 = sshll.u32 %s251_s30, 2  ;;  %s645_s13 = sshll.u32 %s261_s12, 2 }
  0x14   : > { %s253_s10 = scalar_lea.vmem %s903_s0, %s643_s5  ;;  %s263_s23 = scalar_lea.vmem %s904_s1, %s645_s13 }
  0x15   : > { %v274_v4 = vld [vmem:[%s253_s10] sm:$0xf]  ;;  %v277_v5 = vld [vmem:[%s253_s10 + $0x4] sm:$0x1]  ;;  %s923_s15 = smov (!%p267_p8, %s770_s15), 7  ;;  %s646_s26 = sshll.u32 %s919_s16, 3 }
  0x16   : > { %v650_v6 = vcombine.low %v274_v4, %v277_v5  ;;  %684 = vmatmul.mubr.msk.bf16.vlgmr.msra.gmra.mxu1 %vm299_vm1, %v274_v4  ;;  %v745_v11 = vld [vmem:[%s263_s23] sm:$0x1f]   ;;  %s270_s29 = sadd.s32 %s646_s26, %s923_s15 }
  0x17   : > { %694 = vmatpush3.bf16.msra.mxu1 %v747_v3  ;;  %695 = vmatprep.mubr.msk.bf16.mxu1 %vm789_vm0, %v788_v1  ;;  %v457_v13 = vshrl.u32 %v745_v11, 16  ;;  %v459_v14 = vshll.u32 %v745_v11, 16  ;;  %v392_v17 = vld [vmem:[%s263_s23] sm:$0xf]  ;;  %s647_s30 = sshll.u32 %s270_s29, 2 }
  0x18   : > { %v287_v7 = vshrl.u32 %v650_v6, 16  ;;  %v289_v8 = vshll.u32 %v650_v6, 16  ;;  %s272_s16 = scalar_lea.vmem %s907_s4, %s647_s30 }
  0x19   : > { %v461_v15 = vrot.slane %v459_v14, 1 }
  0x1a   : > { %v291_v9 = vrot.slane %v289_v8, 1 }
  0x1b   : > { %v462_v16 = vor.u32 %v461_v15, %v457_v13 }
  0x1c   : > { %v292_v12 = vor.u32 %v291_v9, %v287_v7 }
  0x1e   : > { %678 = vmatmul.mubr.msk.bf16.vlgmr.msra.gmra.mxu0 %vm299_vm1, %v292_v12  ;;  %696 = vmatmul.mubr.msk.bf16.vlgmr.msra.gmra.mxu1 %vm299_vm1, %v462_v16 }
  0x1f   : > { %688 = vmatpush3.bf16.msra.mxu0 %v746_v10  ;;  %689 = vmatprep.mubr.msk.bf16.mxu0 %vm789_vm0, %v788_v1 }
  0x26   : > { %690 = vmatmul.mubr.msk.bf16.vlgmr.msra.gmra.mxu0 %vm299_vm1, %v392_v17 }
  0xd6   : > { %v386_v18 = vpop.f32.mrf.mxu1 }
  0xd8   : > { %v685_v19 = vpop.f32.mrf.mxu1 }
  0xda   : > { %v389_v20 = vpop.f32.mrf.mxu1 }
  0xdc   : > { %v686_v21 = vpop.f32.mrf.mxu1 }
  0xde   : > { %v337_v22 = vpop.f32.mrf.mxu0  ;;  %v506_v25 = vpop.f32.mrf.mxu1 }
  0xdf   : > { %v387_v27 = vadd.f32 %v386_v18, %v337_v22 }
  0xe0   : > { %v679_v23 = vpop.f32.mrf.mxu0  ;;  %v697_v28 = vpop.f32.mrf.mxu1 }
  0xe2   : > { %v340_v24 = vpop.f32.mrf.mxu0  ;;  %v509_v31 = vpop.f32.mrf.mxu1 }
  0xe4   : > { %v680_v26 = vpop.f32.mrf.mxu0  ;;  %v698_v35 = vpop.f32.mrf.mxu1 }
  0xe6   : > { %v439_v29 = vpop.f32.mrf.mxu0 }
  0xe7   : > { %v445_v30 = vadd.f32 %v439_v29, %v387_v27 }
  0xe8   : > { %v691_v33 = vpop.f32.mrf.mxu0 }
  0xe9   : > { %v512_v34 = vadd.f32 %v506_v25, %v445_v30 }
  0xea   : > { %v442_v36 = vpop.f32.mrf.mxu0 }
  0xeb   : > { %v520_v37 = vadd.f32 %v664_v32, %v512_v34 }
  0xec   : > { %v692_v38 = vpop.f32.mrf.mxu0 }
  0xed   : > { %vm521_vm2 = vcmp.ge.f32.partialorder %v520_v37, 0.0  ;;  %v522_v39 = vmul.f32 0.2, %v520_v37 }
  0xef   : > { %v523_v40 = vsel %vm521_vm2, %v520_v37, %v522_v39 }
  0xf0   : > { %v524_v41 = vpack.c.bf16 %v523_v40, %v523_v40 }
  0xf2   : > { %526 = vst.msk [vmem:[%s272_s16] sm:$0xf] %vm525_vm3, %v524_v41 }
  0xf3 PF: > { %s14_s19 = sadd.s32 1, %s786_s19   ;;  %s908_s15 = smov %s778_s17 }
  0xf4   : > { %p11_p9 = scmp.ge.s32.totalorder %s14_s19, 18   ;;  %s909_s16 = smov %s782_s18 }
  0xf5   : > { %s910_s17 = smov %s913_s20  ;;  %s911_s18 = smov %s917_s21 }
  0xf6   :  { %13 = sbr.rel (!%p11_p9) target bundleno = 3 (0x3), region = 72 }

// kernel: discriminator_forward.4
= control target key start
LH: loop header
LB: loop body
LE: loop exit
PB: predicated region body
PF: predicated region fallthrough
CT: control target
= control target key end

     0   :  { %s1782_s21 = smov 0   ;;  %s1784_s22 = smov 0   ;;  %s2061_s0 = inlined_call_operand.vmem [shape: bf16[2,5,5,256], index: 0, kind: input, shape index: {}, may-alias: {0,1}]   ;;  %s2062_s1 = inlined_call_operand.vmem [shape: bf16[2,5,5,256], index: 1, kind: input, shape index: {}, may-alias: {0,1}]   ;;  %s2063_s2 = inlined_call_operand.vmem [shape: bf16[4,256,128], index: 2, kind: input, shape index: {}]   ;;  %s2064_s3 = inlined_call_operand.vmem [shape: f32[1,128], index: 3, kind: input, shape index: {}]   ;;  %s2065_s4 = inlined_call_operand.vmem [shape: bf16[2,4,4,128], index: 4, kind: output, shape index: {0}]   ;;  %s2066_s5 = inlined_call_operand.vmem [shape: f32[2,4,1,128], index: 5, kind: output, shape index: {1}]   ;;  %s2067_s6 = inlined_call_operand.vmem [shape: f32[2,4,1,128], index: 6, kind: output, shape index: {2}]  }
   0x1   :  { %s1786_s23 = smov 0   ;;  %s1788_s24 = smov 0  }
   0x2   :  { %s1790_s25 = smov 0  }
   0x3 LB: > { %s26_s26 = sadd.s32 1, %s1737_s23  ;;  %s29_s27 = sadd.s32 1, %s1741_s24  ;;  %s1745_s25 = sphi %s1790_s25, %s17_s25   ;;  %s1741_s24 = sphi %s1788_s24, %s2071_s24   ;;  %s1737_s23 = sphi %s1786_s23, %s2070_s23   ;;  %s1733_s22 = sphi %s1784_s22, %s2069_s22   ;;  %s1729_s21 = sphi %s1782_s21, %s2068_s21  }
   0x4   : > { %p27_p0 = scmp.ge.s32.totalorder %s26_s26, 4  ;;  %p1326_p1 = scmp.ge.s32.totalorder %s1745_s25, 1 }
   0x5   : > { %p261_p2 = scmp.lt.s32.totalorder %s1745_s25, 9 }
   0x6   : > { %s2073_s26 = smov (%p27_p0, %s26_s26), 0  ;;  %s2075_s27 = smov (!%p27_p0, %s29_s27), %s1741_s24 }
   0x7   : > { %p262_p3 = pnand %p1326_p1, %p261_p2  ;;  %p31_p4 = scmp.ge.s32.totalorder %s2075_s27, 2 }
   0x8   : > { %p322_p5 = scmp.lt.s32.totalorder (!%p262_p3), %s1733_s22, 1  ;;  %p324_p6 = scmp.lt.s32.totalorder (!%p262_p3), %s1729_s21, 4 }
   0x9   : > { %s2077_s27 = smov (%p31_p4, %s2075_s27), 0  ;;  %265 = sbr.rel (%p262_p3) target bundleno = 299 (0x12b), region = 36 }
   0xa   : > { %s331_s9 = sadd.s32 (!%p262_p3), 1, %s1729_s21  ;;  %p344_p8 = scmp.lt.s32.totalorder (!%p262_p3), %s1729_s21, 3 }
   0xb   : > { %p334_p7 = scmp.lt.s32.totalorder (!%p262_p3), %s331_s9, 4 }
   0xe   : > { %v1635_v0 = vld [vmem:[%s2063_s2 + $0xf8] sm:$0xff]   ;;  %v1639_v4 = vld [vmem:[%s2063_s2 + $0xf0] sm:$0xff]   ;;  %v1643_v8 = vld [vmem:[%s2063_s2 + $0xe8] sm:$0xff]   ;;  %s2079_s22 = smov (!%p322_p5, %s1733_s22), 1  ;;  %s2081_s9 = smov (!%p334_p7, %s331_s9), 4  ;;  %vm1112_vm0 = vcmask 1043456  }
   0xf   : > { %v1636_v1 = vld [vmem:[%s2063_s2 + $0x78] sm:$0xff]   ;;  %1506 = vmatprep.subr.bf16.mxu0 %v1635_v0  ;;  %v1640_v5 = vld [vmem:[%s2063_s2 + $0x70] sm:$0xff]   ;;  %v1644_v9 = vld [vmem:[%s2063_s2 + $0x68] sm:$0xff]   ;;  %s325_s28 = scalar_select %p324_p6, %s1729_s21, 4 }
  0x10   : > { %v1637_v2 = vld [vmem:[%s2063_s2 + $0xb8] sm:$0xff]   ;;  %1528 = vmatprep.subr.bf16.mxu1 %v1636_v1  ;;  %v1641_v6 = vld [vmem:[%s2063_s2 + $0xb0] sm:$0xff]   ;;  %v1645_v10 = vld [vmem:[%s2063_s2 + $0xa8] sm:$0xff]   ;;  %s1594_s11 = smul.u32 10, %s2079_s22  ;;  %s1329_s18 = sshll.u32 %s2081_s9, 1 }
  0x11   : > { %v1638_v3 = vld [vmem:[%s2063_s2 + $0x38] sm:$0xff]   ;;  %1507 = vmatpush3.bf16.msra.mxu0 %v1637_v2  ;;  %v1642_v7 = vld [vmem:[%s2063_s2 + $0x30] sm:$0xff]   ;;  %v1646_v11 = vld [vmem:[%s2063_s2 + $0x28] sm:$0xff]   ;;  %s1327_s14 = sshll.u32 %s325_s28, 1  ;;  %s2083_s21 = smov (!%p344_p8, %s1729_s21), 3 }
  0x12   : > { %1529 = vmatpush3.bf16.msra.mxu1 %v1638_v3  ;;  %1508 = vmatprep.subr.bf16.mxu0 %v1639_v4  ;;  %v1647_v12 = vld [vmem:[%s2063_s2 + $0xe0] sm:$0xff]   ;;  %v1651_v16 = vld [vmem:[%s2063_s2 + $0xd8] sm:$0xff]   ;;  %v1655_v20 = vld [vmem:[%s2063_s2 + $0xd0] sm:$0xff]   ;;  %s328_s29 = sadd.s32 %s1594_s11, %s1327_s14  ;;  %s338_s8 = sadd.s32 %s1594_s11, %s1329_s18 }
  0x13   : > { %1530 = vmatprep.subr.bf16.mxu1 %v1640_v5  ;;  %v1648_v13 = vld [vmem:[%s2063_s2 + $0x60] sm:$0xff]   ;;  %v1652_v17 = vld [vmem:[%s2063_s2 + $0x58] sm:$0xff]   ;;  %v1656_v21 = vld [vmem:[%s2063_s2 + $0x50] sm:$0xff]   ;;  %s1328_s12 = sshll.u32 %s328_s29, 2  ;;  %s1330_s16 = sshll.u32 %s338_s8, 2 }
  0x14   : > { %v1649_v14 = vld [vmem:[%s2063_s2 + $0xa0] sm:$0xff]   ;;  %v1653_v18 = vld [vmem:[%s2063_s2 + $0x98] sm:$0xff]   ;;  %v1657_v22 = vld [vmem:[%s2063_s2 + $0x90] sm:$0xff]   ;;  %s330_s30 = scalar_lea.vmem %s2061_s0, %s1328_s12  ;;  %s340_s7 = scalar_lea.vmem %s2062_s1, %s1330_s16 }
  0x15   : > { %1509 = vmatpush3.bf16.msra.mxu0 %v1641_v6  ;;  %v1650_v15 = vld [vmem:[%s2063_s2 + $0x20] sm:$0xff]   ;;  %v1654_v19 = vld [vmem:[%s2063_s2 + $0x18] sm:$0xff]   ;;  %v1658_v23 = vld [vmem:[%s2063_s2 + $0x10] sm:$0xff]   ;;  %s1331_s17 = sshll.u32 %s2079_s22, 2 }
  0x16   : > { %1531 = vmatpush3.bf16.msra.mxu1 %v1642_v7  ;;  %1510 = vmatprep.subr.bf16.mxu0 %v1643_v8  ;;  %v1659_v24 = vld [vmem:[%s2063_s2 + $0xc8] sm:$0xff]   ;;  %v1663_v28 = vld [vmem:[%s2063_s2 + $0xc0] sm:$0xff]   ;;  %v1671_v38 = vld [vmem:[%s2063_s2 + $0x178] sm:$0xff]   ;;  %s2029_s19 = sadd.s32 %s1331_s17, %s2083_s21 }
  0x17   : > { %1532 = vmatprep.subr.bf16.mxu1 %v1644_v9  ;;  %v1660_v25 = vld [vmem:[%s2063_s2 + $0x48] sm:$0xff]   ;;  %v1664_v29 = vld [vmem:[%s2063_s2 + $0x40] sm:$0xff]   ;;  %v1672_v39 = vld [vmem:[%s2063_s2 + $0x1f8] sm:$0xff]   ;;  %s1332_s20 = sshll.u32 %s2029_s19, 1  ;;  %s363_s9 = scalar_lea.vmem %s2067_s6, %s2029_s19 }
  0x18   : > { %v1661_v26 = vld [vmem:[%s2063_s2 + $0x88] sm:$0xff]   ;;  %v1665_v30 = vld [vmem:[%s2063_s2 + $0x80] sm:$0xff]   ;;  %v1673_v46 = vld [vmem:[%s2063_s2 + $0x138] sm:$0xff]   ;;  %s349_s21 = scalar_lea.vmem %s2065_s4, %s1332_s20 }
  0x19   : > { %1511 = vmatpush3.bf16.msra.mxu0 %v1645_v10  ;;  %v1662_v27 = vld [vmem:[%s2063_s2 + $0x8] sm:$0xff]   ;;  %v1666_v31 = vld [vmem:[%s2063_s2] sm:$0xff]   ;;  %v1674_v47 = vld [vmem:[%s2063_s2 + $0x1b8] sm:$0xff]  }
  0x1a   : > { %1533 = vmatpush3.bf16.msra.mxu1 %v1646_v11  ;;  %1512 = vmatprep.subr.bf16.mxu0 %v1647_v12  ;;  %v398_v32 = vld [vmem:[%s330_s30] sm:$0x77]  ;;  %v1676_v50 = vld [vmem:[%s2063_s2 + $0x1f0] sm:$0xff]   ;;  %v1680_v54 = vld [vmem:[%s2063_s2 + $0x1e8] sm:$0xff]  }
  0x1b   : > { %1534 = vmatprep.subr.bf16.mxu1 %v1648_v13  ;;  %v365_v33 = vld [vmem:[%s330_s30] sm:$0x33]  ;;  %v1367_v34 = vcombine.low %v398_v32, %v398_v32  ;;  %v1368_v35 = vcombine.high %v398_v32, %v398_v32  ;;  %v1675_v51 = vld [vmem:[%s2063_s2 + $0x170] sm:$0xff]   ;;  %v1679_v55 = vld [vmem:[%s2063_s2 + $0x168] sm:$0xff]  }
  0x1c   : > { %v1385_v36 = vcombine.low %v365_v33, %v365_v33  ;;  %v1386_v37 = vcombine.high %v365_v33, %v365_v33  ;;  %v1678_v52 = vld [vmem:[%s2063_s2 + $0x1b0] sm:$0xff]   ;;  %v1682_v56 = vld [vmem:[%s2063_s2 + $0x1a8] sm:$0xff]   ;;  %v1684_v58 = vld [vmem:[%s2063_s2 + $0x1e0] sm:$0xff]  }
  0x1d   : > { %1513 = vmatpush3.bf16.msra.mxu0 %v1649_v14  ;;  %v445_v40 = vshrl.u32 %v1368_v35, 16  ;;  %v447_v41 = vshll.u32 %v1368_v35, 16  ;;  %v438_v42 = vshrl.u32 %v1367_v34, 16  ;;  %v440_v43 = vshll.u32 %v1367_v34, 16  ;;  %v1677_v53 = vld [vmem:[%s2063_s2 + $0x130] sm:$0xff]   ;;  %v1681_v57 = vld [vmem:[%s2063_s2 + $0x128] sm:$0xff]  }
  0x1e   : > { %1535 = vmatpush3.bf16.msra.mxu1 %v1650_v15  ;;  %1514 = vmatprep.subr.bf16.mxu0 %v1651_v16  ;;  %v1683_v59 = vld [vmem:[%s2063_s2 + $0x160] sm:$0xff]   ;;  %v1688_v62 = vld [vmem:[%s2063_s2 + $0x1d8] sm:$0xff]   ;;  %v1692_v2 = vld [vmem:[%s2063_s2 + $0x1d0] sm:$0xff]  }
  0x1f   : > { %1536 = vmatprep.subr.bf16.mxu1 %v1652_v17  ;;  %724 = vmatprep.mubr.bf16.mxu1 %v1386_v37  ;;  %v449_v44 = vrot.slane %v447_v41, 1  ;;  %v442_v45 = vrot.slane %v440_v43, 1  ;;  %v1686_v60 = vld [vmem:[%s2063_s2 + $0x1a0] sm:$0xff]   ;;  %v1687_v63 = vld [vmem:[%s2063_s2 + $0x158] sm:$0xff]   ;;  %v1691_v3 = vld [vmem:[%s2063_s2 + $0x150] sm:$0xff]  }
  0x20   : > { %v1685_v61 = vld [vmem:[%s2063_s2 + $0x120] sm:$0xff]   ;;  %v1690_v0 = vld [vmem:[%s2063_s2 + $0x198] sm:$0xff]   ;;  %v1694_v4 = vld [vmem:[%s2063_s2 + $0x190] sm:$0xff]  }
  0x21   : > { %1515 = vmatpush3.bf16.msra.mxu0 %v1653_v18  ;;  %v450_v48 = vor.u32 %v449_v44, %v445_v40  ;;  %v443_v49 = vor.u32 %v442_v45, %v438_v42  ;;  %v1689_v1 = vld [vmem:[%s2063_s2 + $0x118] sm:$0xff]   ;;  %v1693_v5 = vld [vmem:[%s2063_s2 + $0x110] sm:$0xff]   ;;  %v1696_v6 = vld [vmem:[%s2063_s2 + $0x1c8] sm:$0xff]  }
  0x22   : > { %1537 = vmatpush3.bf16.msra.mxu1 %v1654_v19  ;;  %1516 = vmatprep.subr.bf16.mxu0 %v1655_v20  ;;  %v1695_v7 = vld [vmem:[%s2063_s2 + $0x148] sm:$0xff]   ;;  %v1700_v10 = vld [vmem:[%s2063_s2 + $0x1c0] sm:$0xff]  }
  0x23   : > { %1538 = vmatprep.subr.bf16.mxu1 %v1656_v21  ;;  %581 = vmatprep.mubr.bf16.mxu0 %v450_v48  ;;  %v1698_v8 = vld [vmem:[%s2063_s2 + $0x188] sm:$0xff]   ;;  %v1699_v11 = vld [vmem:[%s2063_s2 + $0x140] sm:$0xff]  }
  0x24   : > { %v1697_v9 = vld [vmem:[%s2063_s2 + $0x108] sm:$0xff]   ;;  %v1702_v12 = vld [vmem:[%s2063_s2 + $0x180] sm:$0xff]  }
  0x25   : > { %1517 = vmatpush3.bf16.msra.mxu0 %v1657_v22  ;;  %v732_v13 = vld [vmem:[%s340_s7] sm:$0x33] }
  0x26   : > { %1539 = vmatpush3.bf16.msra.mxu1 %v1658_v23  ;;  %1518 = vmatprep.subr.bf16.mxu0 %v1659_v24  ;;  %v910_v14 = vld [vmem:[%s340_s7] sm:$0x77]  ;;  %v1436_v15 = vcombine.high %v732_v13, %v732_v13  ;;  %v1435_v23 = vcombine.low %v732_v13, %v732_v13  ;;  %s356_s7 = scalar_lea.vmem %s2066_s5, %s2029_s19 }
  0x27   : > { %1540 = vmatprep.subr.bf16.mxu1 %v1660_v25  ;;  %v1485_v16 = vcombine.low %v910_v14, %v910_v14  ;;  %v1486_v17 = vcombine.high %v910_v14, %v910_v14  ;;  %v1701_v18 = vld [vmem:[%s2063_s2 + $0x100] sm:$0xff]  }
  0x28   : > { %v1503_v48 = vld [vmem:[%s2064_s3] ss:$0 sm:$0xff] }
  0x29   : > { %1519 = vmatpush3.bf16.msra.mxu0 %v1661_v26  ;;  %v957_v19 = vshrl.u32 %v1486_v17, 16  ;;  %v959_v20 = vshll.u32 %v1486_v17, 16  ;;  %v950_v21 = vshrl.u32 %v1485_v16, 16  ;;  %v952_v22 = vshll.u32 %v1485_v16, 16 }
  0x2a   : > { %1541 = vmatpush3.bf16.msra.mxu1 %v1662_v27  ;;  %1520 = vmatprep.subr.bf16.mxu0 %v1663_v28 }
  0x2b   : > { %1542 = vmatprep.subr.bf16.mxu1 %v1664_v29  ;;  %v961_v24 = vrot.slane %v959_v20, 1  ;;  %v954_v25 = vrot.slane %v952_v22, 1 }
  0x2d   : > { %1521 = vmatpush3.bf16.msra.mxu0 %v1665_v30  ;;  %v962_v26 = vor.u32 %v961_v24, %v957_v19  ;;  %v955_v27 = vor.u32 %v954_v25, %v950_v21 }
  0x2e   : > { %1543 = vmatpush3.bf16.msra.mxu1 %v1666_v31  ;;  %1550 = vmatprep.subr.bf16.mxu0 %v1671_v38 }
  0x2f   : > { %1572 = vmatprep.subr.bf16.mxu1 %v1672_v39 }
  0x30   : > { %582 = vmatmul.mubr.bf16.vlgmr.msra.gmra.mxu0 %v443_v49 }
  0x31   : > { %725 = vmatmul.mubr.bf16.vlgmr.msra.gmra.mxu1 %v1385_v36  ;;  %1551 = vmatpush3.bf16.msra.mxu0 %v1673_v46 }
  0x32   : > { %1573 = vmatpush3.bf16.msra.mxu1 %v1674_v47  ;;  %1552 = vmatprep.subr.bf16.mxu0 %v1675_v51 }
  0x33   : > { %1574 = vmatprep.subr.bf16.mxu1 %v1676_v50  ;;  %901 = vmatprep.mubr.bf16.mxu0 %v1436_v15 }
  0x34   : > { %1093 = vmatprep.mubr.bf16.mxu1 %v962_v26 }
  0x35   : > { %1553 = vmatpush3.bf16.msra.mxu0 %v1677_v53 }
  0x36   : > { %1575 = vmatpush3.bf16.msra.mxu1 %v1678_v52  ;;  %1554 = vmatprep.subr.bf16.mxu0 %v1679_v55 }
  0x37   : > { %1576 = vmatprep.subr.bf16.mxu1 %v1680_v54 }
  0x39   : > { %1555 = vmatpush3.bf16.msra.mxu0 %v1681_v57 }
  0x3a   : > { %1577 = vmatpush3.bf16.msra.mxu1 %v1682_v56  ;;  %1556 = vmatprep.subr.bf16.mxu0 %v1683_v59 }
  0x3b   : > { %1578 = vmatprep.subr.bf16.mxu1 %v1684_v58 }
  0x3d   : > { %1557 = vmatpush3.bf16.msra.mxu0 %v1685_v61 }
  0x3e   : > { %1579 = vmatpush3.bf16.msra.mxu1 %v1686_v60  ;;  %1558 = vmatprep.subr.bf16.mxu0 %v1687_v63 }
  0x3f   : > { %1580 = vmatprep.subr.bf16.mxu1 %v1688_v62 }
  0x41   : > { %1559 = vmatpush3.bf16.msra.mxu0 %v1689_v1 }
  0x42   : > { %1581 = vmatpush3.bf16.msra.mxu1 %v1690_v0  ;;  %1560 = vmatprep.subr.bf16.mxu0 %v1691_v3 }
  0x43   : > { %1582 = vmatprep.subr.bf16.mxu1 %v1692_v2 }
  0x45   : > { %1561 = vmatpush3.bf16.msra.mxu0 %v1693_v5 }
  0x46   : > { %1583 = vmatpush3.bf16.msra.mxu1 %v1694_v4  ;;  %1562 = vmatprep.subr.bf16.mxu0 %v1695_v7 }
  0x47   : > { %1584 = vmatprep.subr.bf16.mxu1 %v1696_v6 }
  0x49   : > { %1563 = vmatpush3.bf16.msra.mxu0 %v1697_v9 }
  0x4a   : > { %1585 = vmatpush3.bf16.msra.mxu1 %v1698_v8  ;;  %1564 = vmatprep.subr.bf16.mxu0 %v1699_v11 }
  0x4b   : > { %1586 = vmatprep.subr.bf16.mxu1 %v1700_v10 }
  0x4d   : > { %1565 = vmatpush3.bf16.msra.mxu0 %v1701_v18 }
  0x4e   : > { %1587 = vmatpush3.bf16.msra.mxu1 %v1702_v12 }
  0x50   : > { %902 = vmatmul.mubr.bf16.vlgmr.msra.gmra.mxu0 %v1435_v23 }
  0x51   : > { %1094 = vmatmul.mubr.bf16.vlgmr.msra.gmra.mxu1 %v955_v27 }
  0xf0   : > { %v1522_v31 = vpop.f32.mrf.mxu0 }
  0xf1   : > { %v1544_v28 = vpop.f32.mrf.mxu1 }
  0xf2   : > { %v1523_v33 = vpop.f32.mrf.mxu0 }
  0xf3   : > { %v1545_v29 = vpop.f32.mrf.mxu1  ;;  %v1524_v36 = vadd.f32 %v1523_v33, %v1522_v31 }
  0xf4   : > { %v1525_v34 = vpop.f32.mrf.mxu0  ;;  %v1546_v37 = vadd.f32 %v1545_v29, %v1544_v28 }
  0xf5   : > { %v1547_v30 = vpop.f32.mrf.mxu1 }
  0xf6   : > { %v1526_v35 = vpop.f32.mrf.mxu0  ;;  %v727_v41 = vadd.f32 %v1546_v37, %v1524_v36 }
  0xf7   : > { %v1548_v32 = vpop.f32.mrf.mxu1 }
 0x110   : > { %v1566_v38 = vpop.f32.mrf.mxu0 }
 0x111   : > { %v1588_v39 = vpop.f32.mrf.mxu1 }
 0x112   : > { %v1567_v40 = vpop.f32.mrf.mxu0 }
 0x113   : > { %v1568_v42 = vadd.f32 %v1567_v40, %v1566_v38  ;;  %v1589_v43 = vpop.f32.mrf.mxu1 }
 0x114   : > { %v1569_v44 = vpop.f32.mrf.mxu0  ;;  %v1590_v46 = vadd.f32 %v1589_v43, %v1588_v39 }
 0x115   : > { %v909_v45 = vadd.f32 %v1568_v42, %v727_v41  ;;  %v1591_v47 = vpop.f32.mrf.mxu1 }
 0x116   : > { %v1570_v49 = vpop.f32.mrf.mxu0 }
 0x117   : > { %v1101_v50 = vadd.f32 %v1590_v46, %v909_v45  ;;  %v1592_v51 = vpop.f32.mrf.mxu1 }
 0x119   : > { %v1109_v52 = vadd.f32 %v1503_v48, %v1101_v50 }
 0x11b   : > { %v1110_v53 = vpack.c.bf16 %v1109_v52, %v1109_v52  ;;  %v1113_v54 = vsel %vm1112_vm0, %v1109_v52, 0.0  ;;  %v1121_v55 = vmul.f32 %v1109_v52, %v1109_v52 }
 0x11c   : > { %v1114_v56 = vrot.slane %v1113_v54, 4 }
 0x11d   : > { %1111 = vst [vmem:[%s349_s21] sm:$0x3] %v1110_v53  ;;  %v1122_v57 = vsel %vm1112_vm0, %v1121_v55, 0.0 }
 0x11e   : > { %v1115_v58 = vadd.f32 %v1114_v56, %v1113_v54  ;;  %v1123_v59 = vrot.slane %v1122_v57, 4 }
 0x120   : > { %v1116_v60 = vrot.slane %v1115_v58, 2  ;;  %v1124_v61 = vadd.f32 %v1123_v59, %v1122_v57 }
 0x122   : > { %v1117_v62 = vadd.f32 %v1116_v60, %v1115_v58  ;;  %v1125_v63 = vrot.slane %v1124_v61, 2 }
 0x124   : > { %v1118_v0 = vrot.slane %v1117_v62, 1  ;;  %v1126_v1 = vadd.f32 %v1125_v63, %v1124_v61 }
 0x126   : > { %v1119_v2 = vadd.f32 %v1118_v0, %v1117_v62  ;;  %v1127_v3 = vrot.slane %v1126_v1, 1 }
 0x128   : > { %1120 = vst [vmem:[%s356_s7] sm:$0x1] %v1119_v2  ;;  %v1128_v4 = vadd.f32 %v1127_v3, %v1126_v1 }
 0x12a   : > { %1129 = vst [vmem:[%s363_s9] sm:$0x1] %v1128_v4 }
 0x12b PF: > { %s17_s25 = sadd.s32 1, %s1745_s25   ;;  %s2068_s21 = smov %s1737_s23 }
 0x12c   : > { %p14_p9 = scmp.ge.s32.totalorder %s17_s25, 10   ;;  %s2069_s22 = smov %s1741_s24 }
 0x12d   : > { %s2070_s23 = smov %s2073_s26  ;;  %s2071_s24 = smov %s2077_s27 }
 0x12e   :  { %16 = sbr.rel (!%p14_p9) target bundleno = 3 (0x3), region = 96 }

// kernel: discriminator_forward.5
= control target key start
LH: loop header
LB: loop body
LE: loop exit
PB: predicated region body
PF: predicated region fallthrough
CT: control target
= control target key end

     0   :  { %v32_v0 = vlaneseq  ;;  %v620_v2 = vmov 1983009808   ;;  %vm560_vm3 = vcmask 1041408   ;;  %vm608_vm5 = vcmask 1024   ;;  %s810_s4 = inlined_call_operand.<no memory space> [shape: f32[1,1], index: 4, kind: input, shape index: {}]   ;;  %s811_s1 = inlined_call_operand.vmem [shape: f32[1,2048], index: 1, kind: input, shape index: {}]   ;;  %s812_s0 = inlined_call_operand.vmem [shape: bf16[2,2048], index: 0, kind: input, shape index: {}]   ;;  %s813_s2 = inlined_call_operand.vmem [shape: f32[1,2048], index: 2, kind: input, shape index: {}]   ;;  %s814_s3 = inlined_call_operand.vmem [shape: f32[1,2048], index: 3, kind: input, shape index: {}]   ;;  %s815_s5 = inlined_call_operand.vmem [shape: f32[2,1], index: 5, kind: output, shape index: {}]  }
   0x1   :  { %v10_v1 = vstv %s810_s4  ;;  %v99_v3 = vunpack.c.l.s4 %v620_v2  ;;  %v28_v5 = vld [vmem:[%s811_s1] sm:$0xff]  ;;  %v29_v19 = vld [vmem:[%s811_s1 + $0x8] sm:$0xff] }
   0x2   :  { %11 = vst [vmem:[#allocation2] sm:$0x1] %v10_v1  ;;  %v33_v4 = vshrl.u32 %v32_v0, 7  ;;  %v22_v24 = vld [vmem:[%s812_s0] sm:$0xff]  ;;  %v705_v43 = vld [vmem:[%s813_s2 + $0x8] sm:$0xff] }
   0x3   :  { %v100_v6 = vunpack.c.0.s8 %v99_v3  ;;  %v172_v30 = vld [vmem:[%s813_s2] sm:$0xff]  ;;  %v24_v31 = vunpack.c.l.bf16 %v22_v24  ;;  %v25_v52 = vunpack.c.h.bf16 %v22_v24 }
   0x4   :  { %v657_v7 = vsub.s32 0, %v33_v4  ;;  %v659_v8 = vsub.s32 1, %v33_v4  ;;  %v661_v9 = vsub.s32 2, %v33_v4  ;;  %v663_v10 = vsub.s32 3, %v33_v4 }
   0x5   :  { %v665_v11 = vsub.s32 4, %v33_v4  ;;  %v667_v12 = vsub.s32 5, %v33_v4  ;;  %v669_v13 = vsub.s32 6, %v33_v4  ;;  %v671_v14 = vsub.s32 7, %v33_v4 }
   0x6   :  { %v35_v15 = vrot.slane %v28_v5, %v657_v7  ;;  %v39_v16 = vrot.slane %v28_v5, %v659_v8  ;;  %v43_v17 = vrot.slane %v28_v5, %v661_v9  ;;  %v47_v18 = vrot.slane %v28_v5, %v663_v10 }
   0x7   :  { %v51_v20 = vrot.slane %v28_v5, %v665_v11  ;;  %v55_v21 = vrot.slane %v28_v5, %v667_v12  ;;  %v59_v22 = vrot.slane %v28_v5, %v669_v13  ;;  %v63_v23 = vrot.slane %v28_v5, %v671_v14 }
   0x8   :  { %v96_v25 = vcombine.low %v35_v15, %v39_v16  ;;  %v97_v26 = vcombine.low %v43_v17, %v47_v18  ;;  %v687_v27 = vsub.s32 %v100_v6, %v33_v4  ;;  %v67_v28 = vrot.slane %v29_v19, %v657_v7  ;;  %v729_v4 = vld [vmem:[%s812_s0 + $0x8] sm:$0xff] }
   0x9   :  { %v71_v29 = vrot.slane %v29_v19, %v659_v8  ;;  %v75_v32 = vrot.slane %v29_v19, %v661_v9  ;;  %v113_v33 = vcombine.low %v51_v20, %v55_v21  ;;  %v114_v34 = vcombine.low %v59_v22, %v63_v23 }
   0xa   :  { %v79_v35 = vrot.slane %v29_v19, %v663_v10  ;;  %v83_v36 = vrot.slane %v29_v19, %v665_v11  ;;  %v104_v37 = vrot.slane %v96_v25, %v687_v27  ;;  %v111_v38 = vrot.slane %v97_v26, %v687_v27 }
   0xb   :  { %v87_v39 = vrot.slane %v29_v19, %v667_v12  ;;  %v130_v40 = vcombine.low %v67_v28, %v71_v29  ;;  %v179_v41 = vrot.slane %v172_v30, %v657_v7  ;;  %v183_v42 = vrot.slane %v172_v30, %v659_v8  ;;  %v328_v28 = vld [vmem:[%s814_s3] sm:$0xff] }
   0xc   :  { %v187_v44 = vrot.slane %v172_v30, %v661_v9  ;;  %v191_v45 = vrot.slane %v172_v30, %v663_v10  ;;  %v195_v46 = vrot.slane %v172_v30, %v665_v11  ;;  %v199_v47 = vrot.slane %v172_v30, %v667_v12 }
   0xd   :  { %v121_v48 = vrot.slane %v113_v33, %v687_v27  ;;  %v128_v49 = vrot.slane %v114_v34, %v687_v27  ;;  %v203_v50 = vrot.slane %v172_v30, %v669_v13  ;;  %v207_v51 = vrot.slane %v172_v30, %v671_v14 }
   0xe   :  { %v91_v53 = vrot.slane %v29_v19, %v669_v13  ;;  %v112_v54 = vcombine.low %v104_v37, %v111_v38  ;;  %v131_v55 = vcombine.low %v75_v32, %v79_v35  ;;  %v211_v56 = vrot.slane %v705_v43, %v657_v7 }
   0xf   :  { %v215_v57 = vrot.slane %v705_v43, %v659_v8  ;;  %v219_v58 = vrot.slane %v705_v43, %v661_v9  ;;  %v223_v59 = vrot.slane %v705_v43, %v663_v10  ;;  %v95_v60 = vrot.slane %v29_v19, %v671_v14 }
  0x10   :  { %v240_v61 = vcombine.low %v179_v41, %v183_v42  ;;  %v241_v62 = vcombine.low %v187_v44, %v191_v45  ;;  %v257_v63 = vcombine.low %v195_v46, %v199_v47  ;;  %v129_v0 = vcombine.low %v121_v48, %v128_v49  ;;  %v329_v42 = vld [vmem:[%s814_s3 + $0x8] sm:$0xff] }
  0x11   :  { %v138_v1 = vrot.slane %v130_v40, %v687_v27  ;;  %v147_v2 = vcombine.low %v83_v36, %v87_v39  ;;  %v258_v3 = vcombine.low %v203_v50, %v207_v51  ;;  %v145_v5 = vrot.slane %v131_v55, %v687_v27 }
  0x12   :  { %v248_v6 = vrot.slane %v240_v61, %v687_v27  ;;  %v255_v15 = vrot.slane %v241_v62, %v687_v27  ;;  %v265_v16 = vrot.slane %v257_v63, %v687_v27  ;;  %v168_v17 = vmul.f32 %v112_v54, %v24_v31 }
  0x13   :  { %v272_v18 = vrot.slane %v258_v3, %v687_v27  ;;  %v274_v19 = vcombine.low %v211_v56, %v215_v57  ;;  %v275_v20 = vcombine.low %v219_v58, %v223_v59  ;;  %v148_v21 = vcombine.low %v91_v53, %v95_v60 }
  0x14   :  { %v256_v22 = vcombine.low %v248_v6, %v255_v15  ;;  %v26_v23 = vunpack.c.l.bf16 %v729_v4  ;;  %v155_v24 = vrot.slane %v147_v2, %v687_v27  ;;  %v169_v25 = vmul.f32 %v129_v0, %v25_v52 }
  0x15   :  { %v273_v26 = vcombine.low %v265_v16, %v272_v18  ;;  %v146_v29 = vcombine.low %v138_v1, %v145_v5  ;;  %v227_v30 = vrot.slane %v705_v43, %v665_v11  ;;  %v231_v31 = vrot.slane %v705_v43, %v667_v12 }
  0x16   :  { %v235_v32 = vrot.slane %v705_v43, %v669_v13  ;;  %v239_v33 = vrot.slane %v705_v43, %v671_v14  ;;  %v282_v34 = vrot.slane %v274_v19, %v687_v27  ;;  %v289_v35 = vrot.slane %v275_v20, %v687_v27 }
  0x17   :  { %v312_v36 = vadd.f32 %v256_v22, %v168_v17  ;;  %v162_v37 = vrot.slane %v148_v21, %v687_v27  ;;  %v335_v38 = vrot.slane %v328_v28, %v657_v7  ;;  %v339_v39 = vrot.slane %v328_v28, %v659_v8 }
  0x18   :  { %v343_v40 = vrot.slane %v328_v28, %v661_v9  ;;  %v313_v41 = vadd.f32 %v273_v26, %v169_v25  ;;  %v347_v43 = vrot.slane %v328_v28, %v663_v10  ;;  %v351_v44 = vrot.slane %v328_v28, %v665_v11 }
  0x19   :  { %v355_v45 = vrot.slane %v328_v28, %v667_v12  ;;  %v170_v46 = vmul.f32 %v146_v29, %v26_v23  ;;  %v291_v47 = vcombine.low %v227_v30, %v231_v31  ;;  %v359_v48 = vrot.slane %v328_v28, %v669_v13 }
  0x1a   :  { %v363_v49 = vrot.slane %v328_v28, %v671_v14  ;;  %v290_v50 = vcombine.low %v282_v34, %v289_v35  ;;  %v292_v51 = vcombine.low %v235_v32, %v239_v33  ;;  %vm316_vm0 = vcmp.ge.f32.partialorder %v312_v36, 0.0 }
  0x1b   :  { %v320_v52 = vmul.f32 0.2, %v312_v36  ;;  %v367_v53 = vrot.slane %v329_v42, %v657_v7  ;;  %v371_v54 = vrot.slane %v329_v42, %v659_v8  ;;  %v375_v55 = vrot.slane %v329_v42, %v661_v9 }
  0x1c   :  { %v379_v56 = vrot.slane %v329_v42, %v663_v10  ;;  %v321_v57 = vmul.f32 0.2, %v313_v41  ;;  %v396_v58 = vcombine.low %v335_v38, %v339_v39  ;;  %v397_v59 = vcombine.low %v343_v40, %v347_v43 }
  0x1d   :  { %v413_v60 = vcombine.low %v351_v44, %v355_v45  ;;  %v27_v61 = vunpack.c.h.bf16 %v729_v4  ;;  %v163_v62 = vcombine.low %v155_v24, %v162_v37  ;;  %vm317_vm1 = vcmp.ge.f32.partialorder %v313_v41, 0.0 }
  0x1e   :  { %v414_v63 = vcombine.low %v359_v48, %v363_v49  ;;  %v299_v0 = vrot.slane %v291_v47, %v687_v27  ;;  %v404_v1 = vrot.slane %v396_v58, %v687_v27  ;;  %v411_v7 = vrot.slane %v397_v59, %v687_v27 }
  0x1f   :  { %v421_v8 = vrot.slane %v413_v60, %v687_v27  ;;  %v324_v9 = vsel %vm316_vm0, %v312_v36, %v320_v52  ;;  %v430_v2 = vcombine.low %v367_v53, %v371_v54  ;;  %v431_v3 = vcombine.low %v375_v55, %v379_v56 }
  0x20   :  { %v428_v10 = vrot.slane %v414_v63, %v687_v27  ;;  %v306_v5 = vrot.slane %v292_v51, %v687_v27  ;;  %v314_v4 = vadd.f32 %v290_v50, %v170_v46  ;;  %v325_v6 = vsel %vm317_vm1, %v313_v41, %v321_v57 }
  0x21   :  { %v412_v15 = vcombine.low %v404_v1, %v411_v7  ;;  %v383_v16 = vrot.slane %v329_v42, %v665_v11  ;;  %v387_v18 = vrot.slane %v329_v42, %v667_v12  ;;  %v391_v19 = vrot.slane %v329_v42, %v669_v13 }
  0x22   :  { %v429_v17 = vcombine.low %v421_v8, %v428_v10  ;;  %v395_v20 = vrot.slane %v329_v42, %v671_v14  ;;  %v171_v22 = vmul.f32 %v163_v62, %v27_v61  ;;  %v438_v23 = vrot.slane %v430_v2, %v687_v27 }
  0x23   :  { %v468_v21 = vmul.f32 %v412_v15, %v324_v9  ;;  %v445_v24 = vrot.slane %v431_v3, %v687_v27  ;;  %v307_v26 = vcombine.low %v299_v0, %v306_v5  ;;  %v322_v28 = vmul.f32 0.2, %v314_v4 }
  0x24   :  { %v469_v25 = vmul.f32 %v429_v17, %v325_v6  ;;  %vm318_vm2 = vcmp.ge.f32.partialorder %v314_v4, 0.0  ;;  %v447_v11 = vcombine.low %v383_v16, %v387_v18  ;;  %v448_v12 = vcombine.low %v391_v19, %v395_v20 }
  0x25   :  { %v476_v29 = vcombine.high %v468_v21, %v468_v21  ;;  %v483_v30 = vrot.slane %v468_v21, %v687_v27  ;;  %v446_v14 = vcombine.low %v438_v23, %v445_v24  ;;  %v315_v34 = vadd.f32 %v307_v26, %v171_v22 }
  0x26   :  { %v493_v32 = vcombine.high %v469_v25, %v469_v25  ;;  %v500_v33 = vrot.slane %v469_v25, %v687_v27  ;;  %v326_v35 = vsel %vm318_vm2, %v314_v4, %v322_v28  ;;  %v455_v40 = vrot.slane %v447_v11, %v687_v27 }
  0x27   :  { %v490_v13 = vrot.slane %v476_v29, %v687_v27  ;;  %v491_v31 = vcombine.high %v483_v30, %v483_v30  ;;  %v561_v37 = vsel %vm560_vm3, %v483_v30, 0.0  ;;  %v462_v41 = vrot.slane %v448_v12, %v687_v27 }
  0x28   :  { %v470_v43 = vmul.f32 %v446_v14, %v326_v35  ;;  %v507_v44 = vrot.slane %v493_v32, %v687_v27  ;;  %v508_v45 = vcombine.high %v500_v33, %v500_v33  ;;  %v323_v47 = vmul.f32 0.2, %v315_v34 }
  0x29   :  { %v492_v36 = vcombine.high %v490_v13, %v490_v13  ;;  %v562_v38 = vsel %vm560_vm3, %v491_v31, 0.0  ;;  %v564_v39 = vsel %vm560_vm3, %v490_v13, 0.0  ;;  %vm319_vm4 = vcmp.ge.f32.partialorder %v315_v34, 0.0 }
  0x2a   :  { %v563_v42 = vadd.f32 %v562_v38, %v561_v37  ;;  %v568_v49 = vsel %vm560_vm3, %v500_v33, 0.0  ;;  %v463_v50 = vcombine.low %v455_v40, %v462_v41  ;;  %v509_v52 = vcombine.high %v507_v44, %v507_v44 }
  0x2b   :  { %v566_v46 = vsel %vm560_vm3, %v492_v36, 0.0  ;;  %v510_v53 = vcombine.high %v470_v43, %v470_v43  ;;  %v517_v54 = vrot.slane %v470_v43, %v687_v27  ;;  %v570_v55 = vsel %vm560_vm3, %v508_v45, 0.0 }
  0x2c   :  { %v565_v48 = vadd.f32 %v564_v39, %v563_v42  ;;  %v327_v56 = vsel %vm319_vm4, %v315_v34, %v323_v47  ;;  %v572_v58 = vsel %vm560_vm3, %v507_v44, 0.0  ;;  %v574_v63 = vsel %vm560_vm3, %v509_v52, 0.0 }
  0x2d   :  { %v471_v60 = vmul.f32 %v463_v50, %v327_v56  ;;  %v524_v61 = vrot.slane %v510_v53, %v687_v27  ;;  %v525_v62 = vcombine.high %v517_v54, %v517_v54  ;;  %v576_v1 = vsel %vm560_vm3, %v517_v54, 0.0 }
  0x2e   :  { %v567_v51 = vadd.f32 %v566_v46, %v565_v48 }
  0x2f   :  { %v526_v8 = vcombine.high %v524_v61, %v524_v61  ;;  %v527_v9 = vcombine.high %v471_v60, %v471_v60  ;;  %v534_v10 = vrot.slane %v471_v60, %v687_v27  ;;  %v578_v2 = vsel %vm560_vm3, %v525_v62, 0.0 }
  0x30   :  { %v569_v57 = vadd.f32 %v568_v49, %v567_v51  ;;  %v580_v5 = vsel %vm560_vm3, %v524_v61, 0.0 }
  0x31   :  { %v541_v6 = vrot.slane %v527_v9, %v687_v27  ;;  %v542_v15 = vcombine.high %v534_v10, %v534_v10  ;;  %v582_v16 = vsel %vm560_vm3, %v526_v8, 0.0  ;;  %v584_v18 = vsel %vm560_vm3, %v534_v10, 0.0  ;;  %v614_v27 = vld [vmem:[#allocation2] ss:$0 sm:$0xff] }
  0x32   :  { %v571_v59 = vadd.f32 %v570_v55, %v569_v57 }
  0x33   :  { %v543_v20 = vcombine.high %v541_v6, %v541_v6  ;;  %v586_v21 = vsel %vm560_vm3, %v542_v15, 0.0  ;;  %v588_v23 = vsel %vm560_vm3, %v541_v6, 0.0 }
  0x34   :  { %v573_v0 = vadd.f32 %v572_v58, %v571_v59 }
  0x35   :  { %v590_v25 = vsel %vm560_vm3, %v543_v20, 0.0 }
  0x36   :  { %v575_v7 = vadd.f32 %v574_v63, %v573_v0 }
  0x38   :  { %v577_v3 = vadd.f32 %v576_v1, %v575_v7 }
  0x3a   :  { %v579_v4 = vadd.f32 %v578_v2, %v577_v3 }
  0x3c   :  { %v581_v17 = vadd.f32 %v580_v5, %v579_v4 }
  0x3e   :  { %v583_v19 = vadd.f32 %v582_v16, %v581_v17 }
  0x40   :  { %v585_v22 = vadd.f32 %v584_v18, %v583_v19 }
  0x42   :  { %v587_v24 = vadd.f32 %v586_v21, %v585_v22 }
  0x44   :  { %v589_v26 = vadd.f32 %v588_v23, %v587_v24 }
  0x46   :  { %v591_v28 = vadd.f32 %v590_v25, %v589_v26 }
  0x48   :  { %592 = vadd.xlane.f32.xlu0 %v591_v28 }
  0xd1   :  { %v593_v29 = vpop.xlane.xlu0 %592 }
  0xd2   :  { %v601_v30 = vadd.f32 %v614_v27, %v593_v29 }
  0xd4   :  { %v602_v11 = vsub.f32 0.0, %v601_v30 }
  0xd6   :  { %v603_v12 = vmul.f32 1.442695, %v602_v11 }
  0xd8   :  { %616 = vpow2.f32 %v603_v12 }
  0xe5   :  { %v617_v13 = vpop.eup %616 }
  0xe6   :  { %v605_v31 = vadd.f32 1.0, %v617_v13 }
  0xe8   :  { %618 = vrcp.f32 %v605_v31 }
  0xf5   :  { %v619_v14 = vpop.eup %618 }
  0xf6   :  { %609 = vst.msk [vmem:[%s815_s5] sm:$0x3] %vm608_vm5, %v619_v14 }

</bundles_post_ra>
